<compile_context>
chip_gen: v5e
topology: v5e:2x2
jax: 0.10.0
libtpu: 0.0.40
codegen_flags: <defaults>
</compile_context>

<pallas_src>
from math import gcd

import numpy as np
import jax
import jax.numpy as jnp
from jax.experimental import pallas as pl
from jax.experimental.pallas import tpu as pltpu

KH = KW = 3  # 3x3 conv, stride 1, padding 1 ("same")


# ----------------------------------------------------------------------------- kernel
def _make_conv_bn_kernel(cin, nb, p, w_img, block_m):
    """On-chip im2col (9 shifted+masked taps) + one GEMM + BN shift per grid step,
    storing the tile directly in consumer layout (frame, Cout, pixel)."""
    tap_offsets = [(kh - 1) * w_img + (kw - 1) for kh in range(KH) for kw in range(KW)]

    def kernel(w_ref, masks_ref, shift_ref, x_ref, o_ref, cols_ref):
        # w_ref:     (Cout, K)      bf16  folded conv*BN weights        (VMEM resident)
        # masks_ref: (9, block_m)   f32   per-tap border validity masks (VMEM resident)
        # shift_ref: (Cout, 1)      f32   folded conv-bias / BN shift   (VMEM resident)
        # x_ref:     (Cin, block_m) bf16  nb frames, pixels on the lane axis (streamed)
        # o_ref:     (nb, Cout, P)        output tile, consumer layout, lane-dense
        # cols_ref:  (K, block_m)   bf16  scratch: on-chip im2col matrix
        x = x_ref[...]
        for t, off in enumerate(tap_offsets):
            if off == 0:                         # centre tap: no shift, always in-image
                tap = x
            else:
                # tap[:, m] = x[:, m + off] (circular).  Wrapped / out-of-image pixels
                # are zeroed by the mask; frame boundaries coincide with masked rows and
                # columns, so multi-frame blocks and the padded tail block stay correct.
                s = off % block_m
                tap = jnp.concatenate([x[:, s:], x[:, :s]], axis=1)
                valid = masks_ref[t:t + 1, :] != 0.0
                tap = jnp.where(valid, tap, jnp.zeros_like(tap))
            cols_ref[t * cin:(t + 1) * cin, :] = tap

        # Single (Cout, K) x (K, block_m) GEMM on the MXU with f32 accumulation.
        acc = jnp.dot(w_ref[...], cols_ref[...], preferred_element_type=jnp.float32)
        acc = acc + shift_ref[...]

        # Consumer layout on-chip: per-frame lane slices, no post-kernel XLA transpose.
        for n in range(nb):
            o_ref[n] = acc[:, n * p:(n + 1) * p].astype(o_ref.dtype)

    return kernel


# ----------------------------------------------------------------------- tile chooser
def _choose_frames_per_block(n_frames, p, cin, cout, k,
                             lane_target=8192, vmem_budget=40 * 1024 * 1024,
                             min_steps=4):
    """Frames per grid step.  The streamed input block's lane extent nb*p must be a
    multiple of 128 (BlockSpec rule) unless it spans the whole array; also keep it under
    the lane target, the live-VMEM budget (sized for v7x's 64 MiB physical VMEM) and
    leave >= min_steps grid steps for pipelining / the v7x two-TensorCore split."""
    def live_vmem_bytes(nb):
        bm = nb * p
        return (2 * cin * bm * 2           # x tile, bf16, double-buffered
                + k * bm * 2               # im2col scratch, bf16
                + cout * bm * 4            # f32 accumulator
                + 2 * nb * cout * p * 2    # output tile, bf16, double-buffered
                + 9 * bm * 4               # resident tap masks, f32
                + 2 * (cout * k * 2 + cout * 4))   # resident weights + shift

    nb_vmem = n_frames
    while nb_vmem > 1 and live_vmem_bytes(nb_vmem) > vmem_budget:
        nb_vmem -= 1
    nb_soft = min(nb_vmem, max(1, lane_target // p))
    if n_frames >= min_steps:
        nb_soft = min(nb_soft, max(1, n_frames // min_steps))
    nb0 = 128 // gcd(p, 128)               # smallest nb with (nb * p) % 128 == 0
    nb = max(nb0, (nb_soft // nb0) * nb0)
    if nb <= min(nb_vmem, n_frames):
        return nb
    return n_frames                         # full-extent block is always a legal lane size


def _tap_masks(nb, h_img, w_img):
    """(9, nb*H*W) f32 validity masks: 1 where the shifted tap reads an in-image pixel."""
    p = h_img * w_img
    pix = np.arange(nb * p) % p
    hh, ww = pix // w_img, pix % w_img
    rows = []
    for kh in range(KH):
        for kw in range(KW):
            dh, dw = kh - 1, kw - 1
            valid = ((hh + dh >= 0) & (hh + dh < h_img) &
                     (ww + dw >= 0) & (ww + dw < w_img))
            rows.append(valid.astype(np.float32))
    return jnp.asarray(np.stack(rows, axis=0))


# ---------------------------------------------------------------------------- wrapper
def spike_module_conv_bn(x_seq, w_hwio, conv_bias, gamma, beta, run_mean, run_var,
                         eps=1e-5, out_dtype=jnp.bfloat16,
                         lane_target=8192, vmem_budget_bytes=40 * 1024 * 1024):
    """x_seq: [B, T, Cin, H, W] (PyTorch NCHW per frame). Returns [B, T, Cout, H, W]."""
    B, T, Cin, H, W = map(int, x_seq.shape)
    Cout = int(w_hwio.shape[-1])
    N = B * T                      # SpikeModule.forward: x.reshape(B*T, ...)
    P = H * W
    K = KH * KW * Cin
    M = N * P

    # --- fold BatchNorm (eval) into the conv weights / bias ----------------------
    scale = (gamma / jnp.sqrt(run_var + eps)).astype(jnp.float32)             # (Cout,)
    w_folded = w_hwio.astype(jnp.float32) * scale                             # (KH,KW,Cin,Cout)
    w_t = w_folded.reshape(K, Cout).T.astype(jnp.bfloat16)                    # (Cout, K)
    shift = ((conv_bias - run_mean) * scale + beta).astype(jnp.float32).reshape(Cout, 1)

    # --- activations -> channels-major, pixels on the lane axis ------------------
    # One fused transpose+cast XLA pass; no 9x im2col materialized in HBM.
    x2d = (jnp.transpose(x_seq.reshape(N, Cin, P), (1, 0, 2))
           .reshape(Cin, M).astype(jnp.bfloat16))                             # (Cin, M)

    nb = _choose_frames_per_block(N, P, Cin, Cout, K, lane_target, vmem_budget_bytes)
    block_m = nb * P
    grid = (pl.cdiv(N, nb),)       # cdiv: nb need not divide N (masked/dropped tail)
    masks = _tap_masks(nb, H, W)   # (9, block_m) f32, VMEM-resident

    kernel = _make_conv_bn_kernel(Cin, nb, P, W, block_m)

    out = pl.pallas_call(
        kernel,
        out_shape=jax.ShapeDtypeStruct((N, Cout, P), out_dtype),
        grid_spec=pltpu.PrefetchScalarGridSpec(
            num_scalar_prefetch=0,
            grid=grid,
            in_specs=[
                pl.BlockSpec((Cout, K), lambda m: (0, 0)),        # folded weights: resident
                pl.BlockSpec((9, block_m), lambda m: (0, 0)),     # tap masks: resident
                pl.BlockSpec((Cout, 1), lambda m: (0, 0)),        # BN/conv shift: resident
                pl.BlockSpec((Cin, block_m), lambda m: (0, m)),   # activations: streamed
            ],
            out_specs=pl.BlockSpec((nb, Cout, P), lambda m: (m, 0, 0)),
            scratch_shapes=[pltpu.VMEM((K, block_m), jnp.bfloat16)],
        ),
        compiler_params=pltpu.CompilerParams(
            dimension_semantics=("parallel",),      # independent M blocks -> v7x 2-TC split
            vmem_limit_bytes=48 * 1024 * 1024,      # <= v7x's 64 MiB physical VMEM
        ),
    )(w_t, masks, shift, x2d)

    # (N, Cout, H*W) -> view(B, T, Cout, H, W): free metadata reshape (no HBM pass).
    return out.reshape(B, T, Cout, H, W)


# -------------------------------------------------------------------------- reference
def reference(x_seq, w_hwio, conv_bias, gamma, beta, run_mean, run_var, eps=1e-5):
    """Pure-JAX reference mimicking the PyTorch Conv2d + BatchNorm2d(eval) path."""
    B, T, Cin, H, W = x_seq.shape
    Cout = w_hwio.shape[-1]
    xf = x_seq.reshape(B * T, Cin, H, W)
    w_oihw = jnp.transpose(w_hwio, (3, 2, 0, 1))
    y = jax.lax.conv_general_dilated(
        xf, w_oihw, window_strides=(1, 1), padding=((1, 1), (1, 1)),
        dimension_numbers=("NCHW", "OIHW", "NCHW"))
    y = y + conv_bias[None, :, None, None]
    scale = gamma / jnp.sqrt(run_var + eps)
    y = (y - run_mean[None, :, None, None]) * scale[None, :, None, None] \
        + beta[None, :, None, None]
    return y.reshape(B, T, Cout, H, W)


if __name__ == "__main__":
    B, T, Cin, H, W, Cout = 2, 8, 4, 16, 16, 8

    key = jax.random.PRNGKey(0)
    k_x, k_w, k_b = jax.random.split(key, 3)

    x_seq = jax.random.normal(k_x, (B, T, Cin, H, W), dtype=jnp.float32)
    # Deterministic synthetic parameters (no checkpoint).
    w_hwio = jax.random.normal(k_w, (KH, KW, Cin, Cout), dtype=jnp.float32) * 0.1
    conv_bias = jax.random.normal(k_b, (Cout,), dtype=jnp.float32) * 0.05
    gamma = jnp.linspace(0.8, 1.2, Cout, dtype=jnp.float32)
    beta = jnp.linspace(-0.1, 0.1, Cout, dtype=jnp.float32)
    run_mean = jnp.linspace(-0.2, 0.2, Cout, dtype=jnp.float32)
    run_var = jnp.linspace(0.5, 1.5, Cout, dtype=jnp.float32)

    y = spike_module_conv_bn(x_seq, w_hwio, conv_bias, gamma, beta, run_mean, run_var)
    y = jax.block_until_ready(y)

    y_ref = reference(x_seq, w_hwio, conv_bias, gamma, beta, run_mean, run_var)
    # bf16 MXU inputs + bf16 output store with f32 accumulation -> relaxed tolerance.
    y_f32 = np.asarray(jnp.asarray(y, jnp.float32))
    np.testing.assert_allclose(y_f32, np.asarray(y_ref), rtol=2e-2, atol=2e-2)
    assert y.shape == (B, T, Cout, H, W)

    print("KERNEL_OK")
</pallas_src>

<mosaic_0001>
module attributes {stable_mosaic.version = 11 : i64} {
  func.func @kernel(%arg0: i32, %arg1: memref<8x36xbf16, #tpu.memory_space<vmem>>, %arg2: memref<9x1024xf32, #tpu.memory_space<vmem>>, %arg3: memref<8x1xf32, #tpu.memory_space<vmem>>, %arg4: memref<4x1024xbf16, #tpu.memory_space<vmem>>, %arg5: memref<4x8x256xbf16, #tpu.memory_space<vmem>>, %arg6: memref<36x1024xbf16, #tpu.memory_space<vmem>>) attributes {dimension_semantics = [#tpu.dimension_semantics<parallel>], iteration_bounds = array<i64: 4>, scalar_prefetch = 0 : i64, scratch_operands = 1 : i64, tpu.core_type = #tpu.core_type<tc>, window_params = [{pipeline_mode = #tpu.pipeline_mode<synchronous>, transform_indices = @transform_0, window_bounds = array<i64: 8, 36>}, {pipeline_mode = #tpu.pipeline_mode<synchronous>, transform_indices = @transform_1, window_bounds = array<i64: 9, 1024>}, {pipeline_mode = #tpu.pipeline_mode<synchronous>, transform_indices = @transform_2, window_bounds = array<i64: 8, 1>}, {transform_indices = @transform_3, window_bounds = array<i64: 4, 1024>}, {transform_indices = @transform_4, window_bounds = array<i64: 4, 8, 256>}]} {
    %c0 = arith.constant 0 : index
    %c0_0 = arith.constant 0 : index
    %0 = vector.load %arg4[%c0, %c0_0] : memref<4x1024xbf16, #tpu.memory_space<vmem>>, vector<4x1024xbf16>
    %1 = vector.extract_strided_slice %0 {offsets = [0, 1007], sizes = [4, 17], strides = [1, 1]} : vector<4x1024xbf16> to vector<4x17xbf16>
    %2 = vector.extract_strided_slice %0 {offsets = [0, 0], sizes = [4, 1007], strides = [1, 1]} : vector<4x1024xbf16> to vector<4x1007xbf16>
    %3 = tpu.concatenate %1, %2 in 1 : vector<4x17xbf16>, vector<4x1007xbf16> -> vector<4x1024xbf16>
    %c0_1 = arith.constant 0 : index
    %c0_2 = arith.constant 0 : index
    %4 = vector.load %arg2[%c0_1, %c0_2] : memref<9x1024xf32, #tpu.memory_space<vmem>>, vector<1x1024xf32>
    %cst = arith.constant 0.000000e+00 : f32
    %5 = vector.broadcast %cst : f32 to vector<1x1024xf32>
    %6 = arith.cmpf one, %4, %5 : vector<1x1024xf32>
    %cst_3 = arith.constant 0.000000e+00 : bf16
    %7 = vector.broadcast %cst_3 : bf16 to vector<4x1024xbf16>
    %8 = vector.shape_cast %6 : vector<1x1024xi1> to vector<1x1024xi1>
    %9 = vector.broadcast %8 : vector<1x1024xi1> to vector<4x1024xi1>
    %10 = arith.select %9, %3, %7 : vector<4x1024xi1>, vector<4x1024xbf16>
    %c0_4 = arith.constant 0 : index
    %c0_5 = arith.constant 0 : index
    %11 = vector.load %arg6[%c0_4, %c0_5] : memref<36x1024xbf16, #tpu.memory_space<vmem>>, vector<4x1024xbf16>
    tpu.vector_store %arg6[%c0_4, %c0_5], %10 {strides = array<i32>} : memref<36x1024xbf16, #tpu.memory_space<vmem>>, vector<4x1024xbf16>,
    %12 = vector.extract_strided_slice %0 {offsets = [0, 1008], sizes = [4, 16], strides = [1, 1]} : vector<4x1024xbf16> to vector<4x16xbf16>
    %13 = vector.extract_strided_slice %0 {offsets = [0, 0], sizes = [4, 1008], strides = [1, 1]} : vector<4x1024xbf16> to vector<4x1008xbf16>
    %14 = tpu.concatenate %12, %13 in 1 : vector<4x16xbf16>, vector<4x1008xbf16> -> vector<4x1024xbf16>
    %c1 = arith.constant 1 : index
    %c0_6 = arith.constant 0 : index
    %15 = vector.load %arg2[%c1, %c0_6] : memref<9x1024xf32, #tpu.memory_space<vmem>>, vector<1x1024xf32>
    %cst_7 = arith.constant 0.000000e+00 : f32
    %16 = vector.broadcast %cst_7 : f32 to vector<1x1024xf32>
    %17 = arith.cmpf one, %15, %16 : vector<1x1024xf32>
    %cst_8 = arith.constant 0.000000e+00 : bf16
    %18 = vector.broadcast %cst_8 : bf16 to vector<4x1024xbf16>
    %19 = vector.shape_cast %17 : vector<1x1024xi1> to vector<1x1024xi1>
    %20 = vector.broadcast %19 : vector<1x1024xi1> to vector<4x1024xi1>
    %21 = arith.select %20, %14, %18 : vector<4x1024xi1>, vector<4x1024xbf16>
    %c4 = arith.constant 4 : index
    %c0_9 = arith.constant 0 : index
    %22 = vector.load %arg6[%c4, %c0_9] : memref<36x1024xbf16, #tpu.memory_space<vmem>>, vector<4x1024xbf16>
    tpu.vector_store %arg6[%c4, %c0_9], %21 {strides = array<i32>} : memref<36x1024xbf16, #tpu.memory_space<vmem>>, vector<4x1024xbf16>,
    %23 = vector.extract_strided_slice %0 {offsets = [0, 1009], sizes = [4, 15], strides = [1, 1]} : vector<4x1024xbf16> to vector<4x15xbf16>
    %24 = vector.extract_strided_slice %0 {offsets = [0, 0], sizes = [4, 1009], strides = [1, 1]} : vector<4x1024xbf16> to vector<4x1009xbf16>
    %25 = tpu.concatenate %23, %24 in 1 : vector<4x15xbf16>, vector<4x1009xbf16> -> vector<4x1024xbf16>
    %c2 = arith.constant 2 : index
    %c0_10 = arith.constant 0 : index
    %26 = vector.load %arg2[%c2, %c0_10] : memref<9x1024xf32, #tpu.memory_space<vmem>>, vector<1x1024xf32>
    %cst_11 = arith.constant 0.000000e+00 : f32
    %27 = vector.broadcast %cst_11 : f32 to vector<1x1024xf32>
    %28 = arith.cmpf one, %26, %27 : vector<1x1024xf32>
    %cst_12 = arith.constant 0.000000e+00 : bf16
    %29 = vector.broadcast %cst_12 : bf16 to vector<4x1024xbf16>
    %30 = vector.shape_cast %28 : vector<1x1024xi1> to vector<1x1024xi1>
    %31 = vector.broadcast %30 : vector<1x1024xi1> to vector<4x1024xi1>
    %32 = arith.select %31, %25, %29 : vector<4x1024xi1>, vector<4x1024xbf16>
    %c8 = arith.constant 8 : index
    %c0_13 = arith.constant 0 : index
    %33 = vector.load %arg6[%c8, %c0_13] : memref<36x1024xbf16, #tpu.memory_space<vmem>>, vector<4x1024xbf16>
    tpu.vector_store %arg6[%c8, %c0_13], %32 {strides = array<i32>} : memref<36x1024xbf16, #tpu.memory_space<vmem>>, vector<4x1024xbf16>,
    %34 = vector.extract_strided_slice %0 {offsets = [0, 1023], sizes = [4, 1], strides = [1, 1]} : vector<4x1024xbf16> to vector<4x1xbf16>
    %35 = vector.extract_strided_slice %0 {offsets = [0, 0], sizes = [4, 1023], strides = [1, 1]} : vector<4x1024xbf16> to vector<4x1023xbf16>
    %36 = tpu.concatenate %34, %35 in 1 : vector<4x1xbf16>, vector<4x1023xbf16> -> vector<4x1024xbf16>
    %c3 = arith.constant 3 : index
    %c0_14 = arith.constant 0 : index
    %37 = vector.load %arg2[%c3, %c0_14] : memref<9x1024xf32, #tpu.memory_space<vmem>>, vector<1x1024xf32>
    %cst_15 = arith.constant 0.000000e+00 : f32
    %38 = vector.broadcast %cst_15 : f32 to vector<1x1024xf32>
    %39 = arith.cmpf one, %37, %38 : vector<1x1024xf32>
    %cst_16 = arith.constant 0.000000e+00 : bf16
    %40 = vector.broadcast %cst_16 : bf16 to vector<4x1024xbf16>
    %41 = vector.shape_cast %39 : vector<1x1024xi1> to vector<1x1024xi1>
    %42 = vector.broadcast %41 : vector<1x1024xi1> to vector<4x1024xi1>
    %43 = arith.select %42, %36, %40 : vector<4x1024xi1>, vector<4x1024xbf16>
    %c12 = arith.constant 12 : index
    %c0_17 = arith.constant 0 : index
    %44 = vector.load %arg6[%c12, %c0_17] : memref<36x1024xbf16, #tpu.memory_space<vmem>>, vector<4x1024xbf16>
    tpu.vector_store %arg6[%c12, %c0_17], %43 {strides = array<i32>} : memref<36x1024xbf16, #tpu.memory_space<vmem>>, vector<4x1024xbf16>,
    %c16 = arith.constant 16 : index
    %c0_18 = arith.constant 0 : index
    %45 = vector.load %arg6[%c16, %c0_18] : memref<36x1024xbf16, #tpu.memory_space<vmem>>, vector<4x1024xbf16>
    tpu.vector_store %arg6[%c16, %c0_18], %0 {strides = array<i32>} : memref<36x1024xbf16, #tpu.memory_space<vmem>>, vector<4x1024xbf16>,
    %46 = vector.extract_strided_slice %0 {offsets = [0, 1], sizes = [4, 1023], strides = [1, 1]} : vector<4x1024xbf16> to vector<4x1023xbf16>
    %47 = vector.extract_strided_slice %0 {offsets = [0, 0], sizes = [4, 1], strides = [1, 1]} : vector<4x1024xbf16> to vector<4x1xbf16>
    %48 = tpu.concatenate %46, %47 in 1 : vector<4x1023xbf16>, vector<4x1xbf16> -> vector<4x1024xbf16>
    %c5 = arith.constant 5 : index
    %c0_19 = arith.constant 0 : index
    %49 = vector.load %arg2[%c5, %c0_19] : memref<9x1024xf32, #tpu.memory_space<vmem>>, vector<1x1024xf32>
    %cst_20 = arith.constant 0.000000e+00 : f32
    %50 = vector.broadcast %cst_20 : f32 to vector<1x1024xf32>
    %51 = arith.cmpf one, %49, %50 : vector<1x1024xf32>
    %cst_21 = arith.constant 0.000000e+00 : bf16
    %52 = vector.broadcast %cst_21 : bf16 to vector<4x1024xbf16>
    %53 = vector.shape_cast %51 : vector<1x1024xi1> to vector<1x1024xi1>
    %54 = vector.broadcast %53 : vector<1x1024xi1> to vector<4x1024xi1>
    %55 = arith.select %54, %48, %52 : vector<4x1024xi1>, vector<4x1024xbf16>
    %c20 = arith.constant 20 : index
    %c0_22 = arith.constant 0 : index
    %56 = vector.load %arg6[%c20, %c0_22] : memref<36x1024xbf16, #tpu.memory_space<vmem>>, vector<4x1024xbf16>
    tpu.vector_store %arg6[%c20, %c0_22], %55 {strides = array<i32>} : memref<36x1024xbf16, #tpu.memory_space<vmem>>, vector<4x1024xbf16>,
    %57 = vector.extract_strided_slice %0 {offsets = [0, 15], sizes = [4, 1009], strides = [1, 1]} : vector<4x1024xbf16> to vector<4x1009xbf16>
    %58 = vector.extract_strided_slice %0 {offsets = [0, 0], sizes = [4, 15], strides = [1, 1]} : vector<4x1024xbf16> to vector<4x15xbf16>
    %59 = tpu.concatenate %57, %58 in 1 : vector<4x1009xbf16>, vector<4x15xbf16> -> vector<4x1024xbf16>
    %c6 = arith.constant 6 : index
    %c0_23 = arith.constant 0 : index
    %60 = vector.load %arg2[%c6, %c0_23] : memref<9x1024xf32, #tpu.memory_space<vmem>>, vector<1x1024xf32>
    %cst_24 = arith.constant 0.000000e+00 : f32
    %61 = vector.broadcast %cst_24 : f32 to vector<1x1024xf32>
    %62 = arith.cmpf one, %60, %61 : vector<1x1024xf32>
    %cst_25 = arith.constant 0.000000e+00 : bf16
    %63 = vector.broadcast %cst_25 : bf16 to vector<4x1024xbf16>
    %64 = vector.shape_cast %62 : vector<1x1024xi1> to vector<1x1024xi1>
    %65 = vector.broadcast %64 : vector<1x1024xi1> to vector<4x1024xi1>
    %66 = arith.select %65, %59, %63 : vector<4x1024xi1>, vector<4x1024xbf16>
    %c24 = arith.constant 24 : index
    %c0_26 = arith.constant 0 : index
    %67 = vector.load %arg6[%c24, %c0_26] : memref<36x1024xbf16, #tpu.memory_space<vmem>>, vector<4x1024xbf16>
    tpu.vector_store %arg6[%c24, %c0_26], %66 {strides = array<i32>} : memref<36x1024xbf16, #tpu.memory_space<vmem>>, vector<4x1024xbf16>,
    %68 = vector.extract_strided_slice %0 {offsets = [0, 16], sizes = [4, 1008], strides = [1, 1]} : vector<4x1024xbf16> to vector<4x1008xbf16>
    %69 = vector.extract_strided_slice %0 {offsets = [0, 0], sizes = [4, 16], strides = [1, 1]} : vector<4x1024xbf16> to vector<4x16xbf16>
    %70 = tpu.concatenate %68, %69 in 1 : vector<4x1008xbf16>, vector<4x16xbf16> -> vector<4x1024xbf16>
    %c7 = arith.constant 7 : index
    %c0_27 = arith.constant 0 : index
    %71 = vector.load %arg2[%c7, %c0_27] : memref<9x1024xf32, #tpu.memory_space<vmem>>, vector<1x1024xf32>
    %cst_28 = arith.constant 0.000000e+00 : f32
    %72 = vector.broadcast %cst_28 : f32 to vector<1x1024xf32>
    %73 = arith.cmpf one, %71, %72 : vector<1x1024xf32>
    %cst_29 = arith.constant 0.000000e+00 : bf16
    %74 = vector.broadcast %cst_29 : bf16 to vector<4x1024xbf16>
    %75 = vector.shape_cast %73 : vector<1x1024xi1> to vector<1x1024xi1>
    %76 = vector.broadcast %75 : vector<1x1024xi1> to vector<4x1024xi1>
    %77 = arith.select %76, %70, %74 : vector<4x1024xi1>, vector<4x1024xbf16>
    %c28 = arith.constant 28 : index
    %c0_30 = arith.constant 0 : index
    %78 = vector.load %arg6[%c28, %c0_30] : memref<36x1024xbf16, #tpu.memory_space<vmem>>, vector<4x1024xbf16>
    tpu.vector_store %arg6[%c28, %c0_30], %77 {strides = array<i32>} : memref<36x1024xbf16, #tpu.memory_space<vmem>>, vector<4x1024xbf16>,
    %79 = vector.extract_strided_slice %0 {offsets = [0, 17], sizes = [4, 1007], strides = [1, 1]} : vector<4x1024xbf16> to vector<4x1007xbf16>
    %80 = vector.extract_strided_slice %0 {offsets = [0, 0], sizes = [4, 17], strides = [1, 1]} : vector<4x1024xbf16> to vector<4x17xbf16>
    %81 = tpu.concatenate %79, %80 in 1 : vector<4x1007xbf16>, vector<4x17xbf16> -> vector<4x1024xbf16>
    %c8_31 = arith.constant 8 : index
    %c0_32 = arith.constant 0 : index
    %82 = vector.load %arg2[%c8_31, %c0_32] : memref<9x1024xf32, #tpu.memory_space<vmem>>, vector<1x1024xf32>
    %cst_33 = arith.constant 0.000000e+00 : f32
    %83 = vector.broadcast %cst_33 : f32 to vector<1x1024xf32>
    %84 = arith.cmpf one, %82, %83 : vector<1x1024xf32>
    %cst_34 = arith.constant 0.000000e+00 : bf16
    %85 = vector.broadcast %cst_34 : bf16 to vector<4x1024xbf16>
    %86 = vector.shape_cast %84 : vector<1x1024xi1> to vector<1x1024xi1>
    %87 = vector.broadcast %86 : vector<1x1024xi1> to vector<4x1024xi1>
    %88 = arith.select %87, %81, %85 : vector<4x1024xi1>, vector<4x1024xbf16>
    %c32 = arith.constant 32 : index
    %c0_35 = arith.constant 0 : index
    %89 = vector.load %arg6[%c32, %c0_35] : memref<36x1024xbf16, #tpu.memory_space<vmem>>, vector<4x1024xbf16>
    tpu.vector_store %arg6[%c32, %c0_35], %88 {strides = array<i32>} : memref<36x1024xbf16, #tpu.memory_space<vmem>>, vector<4x1024xbf16>,
    %c0_36 = arith.constant 0 : index
    %c0_37 = arith.constant 0 : index
    %90 = vector.load %arg1[%c0_36, %c0_37] : memref<8x36xbf16, #tpu.memory_space<vmem>>, vector<8x36xbf16>
    %c0_38 = arith.constant 0 : index
    %c0_39 = arith.constant 0 : index
    %91 = vector.load %arg6[%c0_38, %c0_39] : memref<36x1024xbf16, #tpu.memory_space<vmem>>, vector<36x1024xbf16>
    %cst_40 = arith.constant dense<0.000000e+00> : vector<8x1024xf32>
    %92 = tpu.matmul %90, %91, %cst_40 {dimension_numbers = #tpu.dot_dimension_numbers<[1], [0], [0], [1], [0, 0, 1, 1], [], []>} : vector<8x36xbf16>, vector<36x1024xbf16>, vector<8x1024xf32> -> vector<8x1024xf32>
    %c0_41 = arith.constant 0 : index
    %c0_42 = arith.constant 0 : index
    %93 = vector.load %arg3[%c0_41, %c0_42] : memref<8x1xf32, #tpu.memory_space<vmem>>, vector<8x1xf32>
    %94 = vector.broadcast %93 : vector<8x1xf32> to vector<8x1024xf32>
    %95 = arith.addf %92, %94 : vector<8x1024xf32>
    %96 = vector.extract_strided_slice %95 {offsets = [0, 0], sizes = [8, 256], strides = [1, 1]} : vector<8x1024xf32> to vector<8x256xf32>
    %97 = arith.truncf %96 : vector<8x256xf32> to vector<8x256xbf16>
    %c0_43 = arith.constant 0 : index
    %c0_44 = arith.constant 0 : index
    %c0_45 = arith.constant 0 : index
    %98 = vector.load %arg5[%c0_43, %c0_44, %c0_45] : memref<4x8x256xbf16, #tpu.memory_space<vmem>>, vector<1x8x256xbf16>
    %99 = vector.shape_cast %98 : vector<1x8x256xbf16> to vector<8x256xbf16>
    %100 = vector.shape_cast %97 : vector<8x256xbf16> to vector<1x8x256xbf16>
    tpu.vector_store %arg5[%c0_43, %c0_44, %c0_45], %100 {strides = array<i32>} : memref<4x8x256xbf16, #tpu.memory_space<vmem>>, vector<1x8x256xbf16>,
    %101 = vector.extract_strided_slice %95 {offsets = [0, 256], sizes = [8, 256], strides = [1, 1]} : vector<8x1024xf32> to vector<8x256xf32>
    %102 = arith.truncf %101 : vector<8x256xf32> to vector<8x256xbf16>
    %c1_46 = arith.constant 1 : index
    %c0_47 = arith.constant 0 : index
    %c0_48 = arith.constant 0 : index
    %103 = vector.load %arg5[%c1_46, %c0_47, %c0_48] : memref<4x8x256xbf16, #tpu.memory_space<vmem>>, vector<1x8x256xbf16>
    %104 = vector.shape_cast %103 : vector<1x8x256xbf16> to vector<8x256xbf16>
    %105 = vector.shape_cast %102 : vector<8x256xbf16> to vector<1x8x256xbf16>
    tpu.vector_store %arg5[%c1_46, %c0_47, %c0_48], %105 {strides = array<i32>} : memref<4x8x256xbf16, #tpu.memory_space<vmem>>, vector<1x8x256xbf16>,
    %106 = vector.extract_strided_slice %95 {offsets = [0, 512], sizes = [8, 256], strides = [1, 1]} : vector<8x1024xf32> to vector<8x256xf32>
    %107 = arith.truncf %106 : vector<8x256xf32> to vector<8x256xbf16>
    %c2_49 = arith.constant 2 : index
    %c0_50 = arith.constant 0 : index
    %c0_51 = arith.constant 0 : index
    %108 = vector.load %arg5[%c2_49, %c0_50, %c0_51] : memref<4x8x256xbf16, #tpu.memory_space<vmem>>, vector<1x8x256xbf16>
    %109 = vector.shape_cast %108 : vector<1x8x256xbf16> to vector<8x256xbf16>
    %110 = vector.shape_cast %107 : vector<8x256xbf16> to vector<1x8x256xbf16>
    tpu.vector_store %arg5[%c2_49, %c0_50, %c0_51], %110 {strides = array<i32>} : memref<4x8x256xbf16, #tpu.memory_space<vmem>>, vector<1x8x256xbf16>,
    %111 = vector.extract_strided_slice %95 {offsets = [0, 768], sizes = [8, 256], strides = [1, 1]} : vector<8x1024xf32> to vector<8x256xf32>
    %112 = arith.truncf %111 : vector<8x256xf32> to vector<8x256xbf16>
    %c3_52 = arith.constant 3 : index
    %c0_53 = arith.constant 0 : index
    %c0_54 = arith.constant 0 : index
    %113 = vector.load %arg5[%c3_52, %c0_53, %c0_54] : memref<4x8x256xbf16, #tpu.memory_space<vmem>>, vector<1x8x256xbf16>
    %114 = vector.shape_cast %113 : vector<1x8x256xbf16> to vector<8x256xbf16>
    %115 = vector.shape_cast %112 : vector<8x256xbf16> to vector<1x8x256xbf16>
    tpu.vector_store %arg5[%c3_52, %c0_53, %c0_54], %115 {strides = array<i32>} : memref<4x8x256xbf16, #tpu.memory_space<vmem>>, vector<1x8x256xbf16>,
    return
  }
  func.func @transform_0(%arg0: i32) -> (i32, i32) {
    %c0_i32 = arith.constant 0 : i32
    %c0_i32_0 = arith.constant 0 : i32
    %c0_i32_1 = arith.constant 0 : i32
    return %c0_i32, %c0_i32_0 : i32, i32
  }
  func.func @transform_1(%arg0: i32) -> (i32, i32) {
    %c0_i32 = arith.constant 0 : i32
    %c0_i32_0 = arith.constant 0 : i32
    %c0_i32_1 = arith.constant 0 : i32
    return %c0_i32, %c0_i32_0 : i32, i32
  }
  func.func @transform_2(%arg0: i32) -> (i32, i32) {
    %c0_i32 = arith.constant 0 : i32
    %c0_i32_0 = arith.constant 0 : i32
    %c0_i32_1 = arith.constant 0 : i32
    return %c0_i32, %c0_i32_0 : i32, i32
  }
  func.func @transform_3(%arg0: i32) -> (i32, i32) {
    %c0_i32 = arith.constant 0 : i32
    %c0_i32_0 = arith.constant 0 : i32
    return %c0_i32, %arg0 : i32, i32
  }
  func.func @transform_4(%arg0: i32) -> (i32, i32, i32) {
    %c0_i32 = arith.constant 0 : i32
    %c0_i32_0 = arith.constant 0 : i32
    %c0_i32_1 = arith.constant 0 : i32
    return %arg0, %c0_i32, %c0_i32_0 : i32, i32, i32
  }
}

</mosaic_0001>

<bundles_post_ra>
// kernel: tpu_custom_call.1
= control target key start
LH: loop header
LB: loop body
LE: loop exit
PB: predicated region body
PF: predicated region fallthrough
CT: control target
= control target key end

     0   :  { %9 = vsyncpa [#allocation4], 0  ;;  %s4607_s0 = inlined_call_operand.vmem [shape: bf16[8,36], index: 0, kind: input, shape index: {}]   ;;  %s4608_s1 = inlined_call_operand.hbm [shape: f32[9,1024], index: 1, kind: input, shape index: {}]   ;;  %s4609_s2 = inlined_call_operand.vmem [shape: f32[8,1], index: 2, kind: input, shape index: {}]   ;;  %s4610_s3 = inlined_call_operand.hbm [shape: bf16[4,4096], index: 3, kind: input, shape index: {}]   ;;  %s4611_s4 = inlined_call_operand.hbm [shape: bf16[16,8,256], index: 4, kind: output, shape index: {}]  }
   0x1   :  { %10 = vsyncpa [#allocation7], 0 }
   0x2   :  { %12 = vsyncpa [#allocation7 + $0x1], 0 }
   0x3   :  { %13 = vsyncpa [#allocation5], 0 }
   0x4   :  { %15 = vsyncpa [#allocation5 + $0x1], 0  ;;  %s2518_s15 = smov 0   ;;  %s2520_s16 = smov 0  }
   0x5   :  { %s2522_s17 = smov 0   ;;  %s2524_s18 = smov 0  }
   0x6 LB: > { %s155_s21 = sshll.u32 %s4608_s1, 4  ;;  %s2542_s22 = sadd.s32 4294967295, %s2477_s18   ;;  %s2477_s18 = sphi %s2524_s18, %s4943_s18   ;;  %s2473_s17 = sphi %s2522_s17, %s4942_s17   ;;  %s2469_s16 = sphi %s2520_s16, %s4941_s16   ;;  %s2465_s15 = sphi %s2518_s15, %s4940_s15   ;;  %s156_s21 = int_to_ptr.hbm [resolvable:$true] %s155_s21 }
   0x7   : > { %p2166_p0 = scmp.ge.s32.totalorder %s2477_s18, 1  ;;  %p105_p1 = scmp.eq.s32.totalorder %s2542_s22, 0 }
   0x8   : > { %p141_p2 = scmp.lt.s32.totalorder %s2477_s18, 5  ;;  %s2479_s24 = smov [#allocation3]  }
   0x9   : > { %s157_s25 = sshll.u32 %s2479_s24, 4  ;;  %s2480_s26 = smov 1024   ;;  %s158_s25 = int_to_ptr.vmem [resolvable:$true] %s157_s25 }
   0xa   : > { %p2547_p3 = pnand %p2166_p0, %p141_p2  ;;  %s2481_s27 = smov 64  }
   0xb   : > { %s2165_s28 = sadd.s32 4294967294, %s2477_s18   ;;  %s2557_s29 = sadd.s32 1, %s2477_s18  }
   0xc   : > { %p2284_p4 = pneg %p2547_p3  ;;  %s91_s30 = sadd.s32 1, %s2473_s17 }
   0xd   : > { %s88_s5 = ssub.s32 %s2477_s18, %s2557_s29  ;;  %p98_p6 = scmp.ne.s32.totalorder %s2473_s17, %s2469_s16 }
   0xe   : > { %p2285_p5 = pnand %p2284_p4, %p105_p1  ;;  %p89_p7 = scmp.eq.s32.totalorder %s88_s5, 0 }
   0xf   : > { %p99_p8 = scmp.eq.s32.totalorder %s2477_s18, 0  ;;  %p104_p9 = scmp.ne.s32.totalorder %s2469_s16, %s2465_s15 }
  0x10   : > { %2287 = dma.hbm_to_vmem [thread:$0]  (!%p2285_p5), %s156_s21, 2048, %s158_s25, [#allocation4], %s2480_s26, %s2480_s26, %s2481_s27  }
  0x11   : > { %p128_p10 = scmp.eq.s32.totalorder %s2542_s22, 3  ;;  %p2573_p11 = por %p105_p1, %p104_p9 }
  0x12   : > { %s2569_s6 = scalar_select %p89_p7, %s2473_s17, %s91_s30  }
  0x13   : > { %p2577_p12 = por %p128_p10, %p98_p6  ;;  %p134_p13 = scmp.eq.s32.totalorder %s2165_s28, 3 }
  0x14   : > { %p100_p0 = por %p99_p8, %p98_p6  ;;  %s174_s9 = sand.u32 1, %s2473_s17  }
  0x15   : > { %p2582_p2 = por %p134_p13, %p104_p9  ;;  %p2297_p4 = scmp.lt.s32.totalorder %s2477_s18, 4 }
  0x16   : > { %s2169_s11 = sshll.u32 %s174_s9, 4  ;;  %s2257_s12 = sshll.u32 %s2477_s18, 4 }
  0x17   : > { %s183_s19 = scalar_lea.hbm %s4610_s3, %s2257_s12  ;;  %s178_s21 = scalar_lea.vmem [#allocation6], %s2169_s11 }
  0x18   : > { %s185_s20 = sshll.u32 %s183_s19, 4  ;;  %s187_s24 = sshll.u32 %s178_s21, 4  ;;  %s186_s20 = int_to_ptr.hbm [resolvable:$true] %s185_s20  ;;  %s188_s24 = int_to_ptr.vmem [resolvable:$true] %s187_s24 }
  0x19   : > { %p2591_p5 = pnand %p2297_p4, %p100_p0  ;;  %s175_s26 = scalar_lea.sflag [#allocation7], %s174_s9 }
  0x1a   : > { %s2377_s27 = sshra.s32 %s186_s20, 4  ;;  %s2384_s11 = scalar_lea.hbm %s4610_s3, 64  ;;  %s2378_s27 = int_to_ptr.hbm [resolvable:$true] %s2377_s27 }
  0x1b   : > { %s2379_s28 = scalar_lea.hbm %s2378_s27, 16  ;;  %p2381_p7 = pneg %p2591_p5 }
  0x1c   : > { %p2380_p6 = scmp.ne.s32.totalorder %s2378_s27, %s2379_s28  ;;  %p2385_p10 = scmp.lt.s32.totalorder %s2378_s27, %s4610_s3 }
  0x1d   : > { %p2386_p13 = scmp.lt.s32.totalorder %s2384_s11, %s2379_s28 }
  0x1e   : > { %p2382_p8 = pnand %p2381_p7, %p2380_p6 }
  0x1f   : > { %p2387_p0 = por %p2386_p13, %p2385_p10 }
  0x20   : > { %p2383_p9 = pneg %p2382_p8 }
  0x22   : > { %p2388_p4 = pnand %p2387_p0, %p2383_p9 }
  0x24   : > { %2391 = shalt.err (!%p2388_p4)
}
  0x25   : > { %2291 = dma.hbm_to_vmem [thread:$0]  (!%p2591_p5), %s186_s20, 256, %s188_s24, %s175_s26  }
  0x26   : > { %196 = sbr.rel (%p2547_p3) target bundleno = 540 (0x21c), region = 36 }
  0x2b   : > { %2452 = dma.done.wait (%p105_p1), [#allocation4], 2048  }
  0x2c   : > { %2454 = vsyncadd (%p105_p1), [#allocation4], 4294965248  ;;  %s2612_s9 = sand.u32 1, %s2469_s16  }
  0x2d   : > { %s2174_s14 = sshll.u32 %s2612_s9, 4  ;;  %s204_s19 = scalar_lea.sflag [#allocation7], %s2612_s9 }
  0x2e   : > { %s207_s21 = scalar_lea.vmem [#allocation6], %s2174_s14 }
  0x2f   : > { %2456 = dma.done.wait (%p2573_p11), %s204_s19, 256  }
  0x30   : > { %2458 = vsyncadd (%p2573_p11), %s204_s19, 4294967040  ;;  %v2620_v0 = vld [vmem:[%s207_s21 + $0x8] sm:$0xff]  ;;  %v2624_v1 = vld [vmem:[%s207_s21] sm:$0xff]  ;;  %s2482_s23 = smov 17   ;;  %s2483_s7 = smov 16   ;;  %vm4613_vm15 = vcmask 138240  }
  0x31   : > { %241 = vst [vmem:[#allocation1] ss:$4 sm:$0xff] %v2620_v0  ;;  %s2484_s20 = smov 127   ;;  %s2485_s24 = smov 15  }
  0x32   : > { %249 = vst [vmem:[#allocation1 + $0x20] ss:$4 sm:$0xff] %v2620_v0  ;;  %s2486_s25 = smov 113   ;;  %s2487_s26 = smov 1  }
  0x33   : > { %s2488_s27 = smov 112   ;;  %s2489_s28 = smov 111   ;;  %v302_v62 = vld [vmem:[#allocation3] ss:$8 sm:$0xf] }
  0x34   : > { %v303_v63 = vld [vmem:[#allocation3] ss:$8 sm:$0xf0]  ;;  %s2175_s13 = sshll.u32 %s2612_s9, 5  ;;  %s2275_s19 = sshll.u32 %s2542_s22, 5 }
  0x35   : > { %s232_s14 = scalar_lea.vmem [#allocation8], %s2175_s13  ;;  %s2427_s30 = scalar_lea.hbm %s4611_s4, 128 }
  0x38   : > { %v242_v2 = vld.sshfl [vmem:[#allocation1 + $0x18] sm:$0xff pattern:$0x73625140] }
  0x39   : > { %244 = vrot.lane.b32.xlu0 %v242_v2, %s2482_s23  ;;  %247 = vst [vmem:[#allocation1] ss:$4 sm:$0xff] %v2624_v1  ;;  %v2628_v3 = vld.sshfl [vmem:[#allocation1 + $0x20] sm:$0xff pattern:$0x73625140]  ;;  %v4621_v2 = vmov 0  }
  0x3a   : > { %v2630_v4 = vld.sshfl [vmem:[#allocation1 + $0x28] sm:$0xff pattern:$0x73625140]  ;;  %v2632_v5 = vld.sshfl [vmem:[#allocation1 + $0x30] sm:$0xff pattern:$0x73625140]  ;;  %2346 = vset.pattern.permute.xlu0 %v4621_v2 }
  0x3b   : > { %v2634_v6 = vld.sshfl [vmem:[#allocation1 + $0x38] sm:$0xff pattern:$0x73625140] }
  0x3c   : > { %438 = vst [vmem:[#allocation1 + $0x20] ss:$4 sm:$0xff] %v2620_v0 }
  0x40   : > { %v256_v7 = vld.sshfl [vmem:[#allocation1 + $0x18] sm:$0xff pattern:$0x73625140]  ;;  %v252_v8 = vld.sshfl [vmem:[#allocation1 + $0x8] sm:$0xff pattern:$0x73625140] }
  0x41   : > { %272 = vrot.lane.b32.xlu1 %v256_v7, %s2482_s23  ;;  %268 = vrot.lane.b32.xlu2 %v252_v8, %s2482_s23  ;;  %v254_v9 = vld.sshfl [vmem:[#allocation1 + $0x10] sm:$0xff pattern:$0x73625140]  ;;  %v250_v10 = vld.sshfl [vmem:[#allocation1] sm:$0xff pattern:$0x73625140] }
  0x42   : > { %270 = vrot.lane.b32.xlu0 %v254_v9, %s2482_s23  ;;  %431 = vst [vmem:[#allocation1] ss:$4 sm:$0xff] %v2620_v0 }
  0x43   : > { %v2641_v11 = vld.sshfl [vmem:[#allocation1 + $0x20] sm:$0xff pattern:$0x73625140]  ;;  %v2643_v12 = vld.sshfl [vmem:[#allocation1 + $0x28] sm:$0xff pattern:$0x73625140] }
  0x44   : > { %v2645_v13 = vld.sshfl [vmem:[#allocation1 + $0x30] sm:$0xff pattern:$0x73625140]  ;;  %v2647_v14 = vld.sshfl [vmem:[#allocation1 + $0x38] sm:$0xff pattern:$0x73625140] }
  0x45   : > { %632 = vst [vmem:[#allocation1 + $0x20] ss:$4 sm:$0xff] %v2620_v0 }
  0x49   : > { %266 = vrot.lane.b32.xlu1 %v250_v10, %s2482_s23  ;;  %v432_v15 = vld.sshfl [vmem:[#allocation1 + $0x18] sm:$0xff pattern:$0x73625140] }
  0x4a   : > { %434 = vrot.lane.b32.xlu2 %v432_v15, %s2483_s7  ;;  %436 = vst [vmem:[#allocation1] ss:$4 sm:$0xff] %v2624_v1 }
  0x4c   : > { %v2653_v16 = vld.sshfl [vmem:[#allocation1 + $0x20] sm:$0xff pattern:$0x73625140]  ;;  %v2655_v17 = vld.sshfl [vmem:[#allocation1 + $0x28] sm:$0xff pattern:$0x73625140] }
  0x4d   : > { %v2657_v18 = vld.sshfl [vmem:[#allocation1 + $0x30] sm:$0xff pattern:$0x73625140]  ;;  %v2659_v19 = vld.sshfl [vmem:[#allocation1 + $0x38] sm:$0xff pattern:$0x73625140] }
  0x4e   : > { %822 = vst [vmem:[#allocation1 + $0x20] ss:$4 sm:$0xff] %v2620_v0 }
  0x51   : > { %v445_v20 = vld.sshfl [vmem:[#allocation1 + $0x18] sm:$0xff pattern:$0x73625140]  ;;  %v443_v21 = vld.sshfl [vmem:[#allocation1 + $0x10] sm:$0xff pattern:$0x73625140] }
  0x52   : > { %461 = vrot.lane.b32.xlu1 %v445_v20, %s2483_s7  ;;  %459 = vrot.lane.b32.xlu0 %v443_v21, %s2483_s7  ;;  %v441_v22 = vld.sshfl [vmem:[#allocation1 + $0x8] sm:$0xff pattern:$0x73625140]  ;;  %v439_v23 = vld.sshfl [vmem:[#allocation1] sm:$0xff pattern:$0x73625140] }
  0x53   : > { %457 = vrot.lane.b32.xlu2 %v441_v22, %s2483_s7  ;;  %625 = vst [vmem:[#allocation1] ss:$4 sm:$0xff] %v2620_v0 }
  0x55   : > { %v2666_v24 = vld.sshfl [vmem:[#allocation1 + $0x20] sm:$0xff pattern:$0x73625140]  ;;  %v2668_v25 = vld.sshfl [vmem:[#allocation1 + $0x28] sm:$0xff pattern:$0x73625140] }
  0x56   : > { %v2670_v26 = vld.sshfl [vmem:[#allocation1 + $0x30] sm:$0xff pattern:$0x73625140]  ;;  %v2672_v27 = vld.sshfl [vmem:[#allocation1 + $0x38] sm:$0xff pattern:$0x73625140] }
  0x57   : > { %1026 = vst [vmem:[#allocation1 + $0x20] ss:$4 sm:$0xff] %v2620_v0 }
  0x5a   : > { %455 = vrot.lane.b32.xlu0 %v439_v23, %s2483_s7  ;;  %v626_v28 = vld.sshfl [vmem:[#allocation1 + $0x18] sm:$0xff pattern:$0x73625140] }
  0x5b   : > { %630 = vst [vmem:[#allocation1] ss:$4 sm:$0xff] %v2624_v1  ;;  %v492_v23 = vld [vmem:[#allocation3 + $0x1] ss:$8 sm:$0xf] }
  0x5e   : > { %v2677_v29 = vld.sshfl [vmem:[#allocation1 + $0x28] sm:$0xff pattern:$0x73625140]  ;;  %v1039_v30 = vld.sshfl [vmem:[#allocation1 + $0x30] sm:$0xff pattern:$0x73625140] }
  0x5f   : > { %v2679_v31 = vld.sshfl [vmem:[#allocation1 + $0x38] sm:$0xff pattern:$0x73625140]  ;;  %1055 = vrot.lane.b32.xlu1 %v1039_v30, %s2484_s20  ;;  %v1035_v32 = vld.sshfl [vmem:[#allocation1 + $0x20] sm:$0xff pattern:$0x73625140] }
  0x60   : > { %1051 = vrot.lane.b32.xlu2 %v1035_v32, %s2484_s20  ;;  %1220 = vst [vmem:[#allocation1 + $0x20] ss:$4 sm:$0xff] %v2620_v0 }
  0x62   : > { %v637_v33 = vld.sshfl [vmem:[#allocation1 + $0x10] sm:$0xff pattern:$0x73625140]  ;;  %v639_v34 = vld.sshfl [vmem:[#allocation1 + $0x18] sm:$0xff pattern:$0x73625140] }
  0x63   : > { %653 = vrot.lane.b32.xlu0 %v637_v33, %s2485_s24  ;;  %v635_v35 = vld.sshfl [vmem:[#allocation1 + $0x8] sm:$0xff pattern:$0x73625140]  ;;  %v633_v36 = vld.sshfl [vmem:[#allocation1] sm:$0xff pattern:$0x73625140] }
  0x64   : > { %815 = vst [vmem:[#allocation1] ss:$4 sm:$0xff] %v2620_v0 }
  0x67   : > { %v1229_v37 = vld.sshfl [vmem:[#allocation1 + $0x20] sm:$0xff pattern:$0x73625140]  ;;  %v2686_v38 = vld.sshfl [vmem:[#allocation1 + $0x28] sm:$0xff pattern:$0x73625140] }
  0x68   : > { %v2688_v39 = vld.sshfl [vmem:[#allocation1 + $0x30] sm:$0xff pattern:$0x73625140]  ;;  %v2690_v40 = vld.sshfl [vmem:[#allocation1 + $0x38] sm:$0xff pattern:$0x73625140]  ;;  %1245 = vrot.lane.b32.xlu1 %v1229_v37, %s2486_s25  ;;  %628 = vrot.lane.b32.xlu2 %v626_v28, %s2485_s24 }
  0x69   : > { %1410 = vst [vmem:[#allocation1 + $0x20] ss:$4 sm:$0xff] %v2620_v0  ;;  %v493_v28 = vld [vmem:[#allocation3 + $0x1] ss:$8 sm:$0xf0] }
  0x6a   : > { %v494_v33 = vor.u32 %v493_v28, %v492_v23 }
  0x6b   : > { %649 = vrot.lane.b32.xlu0 %v633_v36, %s2485_s24  ;;  %v816_v41 = vld.sshfl [vmem:[#allocation1 + $0x18] sm:$0xff pattern:$0x73625140] }
  0x6c   : > { %820 = vst [vmem:[#allocation1] ss:$4 sm:$0xff] %v2624_v1  ;;  %vm495_vm6 = vcmp.ne.f32.partialorder %v494_v33, 0.0 }
  0x70   : > { %655 = vrot.lane.b32.xlu1 %v639_v34, %s2485_s24  ;;  %651 = vrot.lane.b32.xlu2 %v635_v35, %s2485_s24  ;;  %v1419_v42 = vld.sshfl [vmem:[#allocation1 + $0x20] sm:$0xff pattern:$0x73625140]  ;;  %v2699_v43 = vld.sshfl [vmem:[#allocation1 + $0x28] sm:$0xff pattern:$0x73625140] }
  0x71   : > { %v1423_v44 = vld.sshfl [vmem:[#allocation1 + $0x30] sm:$0xff pattern:$0x73625140]  ;;  %v2701_v45 = vld.sshfl [vmem:[#allocation1 + $0x38] sm:$0xff pattern:$0x73625140] }
  0x72   : > { %1604 = vst [vmem:[#allocation1 + $0x20] ss:$4 sm:$0xff] %v2620_v0 }
  0x73   : > { %v827_v46 = vld.sshfl [vmem:[#allocation1 + $0x10] sm:$0xff pattern:$0x73625140]  ;;  %v825_v47 = vld.sshfl [vmem:[#allocation1 + $0x8] sm:$0xff pattern:$0x73625140] }
  0x74   : > { %843 = vrot.lane.b32.xlu0 %v827_v46, %s2487_s26  ;;  %v829_v48 = vld.sshfl [vmem:[#allocation1 + $0x18] sm:$0xff pattern:$0x73625140]  ;;  %v823_v49 = vld.sshfl [vmem:[#allocation1] sm:$0xff pattern:$0x73625140] }
  0x75   : > { %1009 = vst [vmem:[#allocation1] ss:$2 sm:$0xff] %v2624_v1 }
  0x76   : > { %1011 = vst [vmem:[#allocation1 + $0x10] ss:$2 sm:$0xff] %v2620_v0  ;;  %v304_v0 = vor.u32 %v303_v63, %v302_v62 }
  0x78   : > { %1435 = vrot.lane.b32.xlu2 %v1419_v42, %s2488_s27  ;;  %818 = vrot.lane.b32.xlu1 %v816_v41, %s2487_s26  ;;  %vm305_vm0 = vcmp.ne.f32.partialorder %v304_v0, 0.0 }
  0x79   : > { %v1617_v50 = vld.sshfl [vmem:[#allocation1 + $0x30] sm:$0xff pattern:$0x73625140]  ;;  %v1613_v51 = vld.sshfl [vmem:[#allocation1 + $0x20] sm:$0xff pattern:$0x73625140] }
  0x7a   : > { %v1619_v60 = vld.sshfl [vmem:[#allocation1 + $0x38] sm:$0xff pattern:$0x73625140]  ;;  %v2724_v7 = vsel %vm305_vm0, 1, %v4621_v2 }
  0x7b   : > { %4637 = vst [vmem:[#allocation12_spill] sm:$0xff] %v2724_v7  ;;  %v309_v20 = vperm.slane %v2724_v7, 2  ;;  %v310_v21 = vperm.slane %v2724_v7, 3  ;;  %v308_v32 = vperm.slane %v2724_v7, 1 }
  0x7c   : > { %1633 = vrot.lane.b32.xlu0 %v1617_v50, %s2489_s28  ;;  %v1012_v52 = vld.sshfl [vmem:[#allocation1] sm:$0xff pattern:$0x75643120]  ;;  %v1013_v53 = vld.sshfl [vmem:[#allocation1 + $0x8] sm:$0xff pattern:$0x75643120] }
  0x7d   : > { %v1014_v54 = vld.sshfl [vmem:[#allocation1 + $0x10] sm:$0xff pattern:$0x75643120]  ;;  %v1015_v55 = vld.sshfl [vmem:[#allocation1 + $0x18] sm:$0xff pattern:$0x75643120] }
  0x7e   : > { %1024 = vst [vmem:[#allocation1] ss:$4 sm:$0xff] %v2624_v1  ;;  %vm317_vm1 = vcmp.eq.s32.totalorder %v309_v20, 1  ;;  %vm318_vm2 = vcmp.eq.s32.totalorder %v310_v21, 1  ;;  %vm2748_vm5 = vcmp.eq.s32.totalorder %v308_v32, 1 }
  0x7f   : > { %1020 = vst [vmem:[#allocation2 + $0x40] sm:$0x33] %v1012_v52  ;;  %vm324_vm3 = vmpackc.low %vm318_vm2, %vm317_vm1  ;;  %v1615_v37 = vld.sshfl [vmem:[#allocation1 + $0x28] sm:$0xff pattern:$0x73625140] }
  0x80   : > { %1629 = vrot.lane.b32.xlu1 %v1613_v51, %s2489_s28  ;;  %841 = vrot.lane.b32.xlu2 %v825_v47, %s2487_s26  ;;  %1021 = vst [vmem:[#allocation2 + $0x48] sm:$0x33] %v1013_v53  ;;  %v328_v34 = vsel %vm324_vm3, 65537, %v4621_v2 }
  0x81   : > { %1022 = vst [vmem:[#allocation2 + $0x50] sm:$0x33] %v1014_v54  ;;  %v333_v41 = vperm.slane %v328_v34, 0  ;;  %v334_v42 = vperm.slane %v328_v34, 4  ;;  %v2776_v54 = vunpack.c.l.b16 %v4621_v2 }
  0x82   : > { %1023 = vst [vmem:[#allocation2 + $0x58] sm:$0x33] %v1015_v55  ;;  %v2779_v55 = vunpack.c.h.b16 %v4621_v2 }
  0x85   : > { %v1031_v56 = vld.sshfl [vmem:[#allocation1 + $0x10] sm:$0xff pattern:$0x73625140]  ;;  %v1033_v57 = vld.sshfl [vmem:[#allocation1 + $0x18] sm:$0xff pattern:$0x73625140] }
  0x86   : > { %v1027_v58 = vld.sshfl [vmem:[#allocation1] sm:$0xff pattern:$0x73625140]  ;;  %v1029_v59 = vld.sshfl [vmem:[#allocation1 + $0x8] sm:$0xff pattern:$0x73625140] }
  0x87   : > { %1074 = vst [vmem:[#allocation1] ss:$4 sm:$0xff] %v2624_v1  ;;  %1045 = vrot.lane.b32.xlu0 %v1029_v59, %s2484_s20 }
  0x88   : > { %845 = vrot.lane.b32.xlu1 %v829_v48, %s2487_s26  ;;  %839 = vrot.lane.b32.xlu2 %v823_v49, %s2487_s26 }
  0x8e   : > { %v1075_v61 = vld.sshfl [vmem:[#allocation1] sm:$0xff pattern:$0x73625140] }
  0x8f   : > { %1218 = vst [vmem:[#allocation1] ss:$4 sm:$0xff] %v2624_v1  ;;  %1077 = vrot.lane.b32.xlu0 %v1075_v61, %s2484_s20 }
  0x90   : > { %1635 = vrot.lane.b32.xlu1 %v1619_v60, %s2489_s28  ;;  %1057 = vrot.lane.b32.xlu2 %v2679_v31, %s2484_s20  ;;  %v307_v31 = vperm.slane %v2724_v7, 0 }
  0x92   : > { %vm2744_vm4 = vcmp.eq.s32.totalorder %v307_v31, 1 }
  0x93   : > { %vm323_vm7 = vmpackc.low %vm2748_vm5, %vm2744_vm4 }
  0x94   : > { %v327_v50 = vsel %vm323_vm7, 65537, %v4621_v2 }
  0x95   : > { %v331_v59 = vperm.slane %v327_v50, 0  ;;  %v332_v60 = vperm.slane %v327_v50, 4  ;;  %v687_v50 = vld [vmem:[#allocation3 + $0x2] ss:$8 sm:$0xf0] }
  0x96   : > { %v1221_v8 = vld.sshfl [vmem:[#allocation1] sm:$0xff pattern:$0x73625140]  ;;  %v1223_v9 = vld.sshfl [vmem:[#allocation1 + $0x8] sm:$0xff pattern:$0x73625140] }
  0x97   : > { %v1225_v10 = vld.sshfl [vmem:[#allocation1 + $0x10] sm:$0xff pattern:$0x73625140]  ;;  %v1227_v15 = vld.sshfl [vmem:[#allocation1 + $0x18] sm:$0xff pattern:$0x73625140]  ;;  %1251 = vrot.lane.b32.xlu0 %v2690_v40, %s2486_s25  ;;  %v346_v21 = vunpack.c.l.b16 %v332_v60  ;;  %v347_v23 = vunpack.c.h.b16 %v332_v60 }
  0x98   : > { %1268 = vst [vmem:[#allocation1] ss:$4 sm:$0xff] %v2624_v1  ;;  %1439 = vrot.lane.b32.xlu1 %v1423_v44, %s2488_s27  ;;  %1049 = vrot.lane.b32.xlu2 %v1033_v57, %s2484_s20  ;;  %v2759_v44 = vsel %vm495_vm6, 1, %v4621_v2  ;;  %v360_v57 = vunpack.c.l.b16 %v334_v42 }
  0x99   : > { %v499_v51 = vperm.slane %v2759_v44, 2  ;;  %v500_v52 = vperm.slane %v2759_v44, 3  ;;  %vm350_vm6 = vcmp.ne.s32.totalorder %v346_v21, %v2776_v54  ;;  %vm351_vm7 = vcmp.ne.s32.totalorder %v347_v23, %v2779_v55 }
  0x9a   : > { %vm364_vm12 = vcmp.ne.s32.totalorder %v360_v57, %v2776_v54 }
  0x9b   : > { %v2733_v22 = vpop.permute.xlu2 %268  ;;  %vm2781_vm8 = vcmp.eq.s32.totalorder %v499_v51, 1  ;;  %vm2785_vm9 = vcmp.eq.s32.totalorder %v500_v52, 1 }
  0x9c   : > { %vm514_vm14 = vmpackc.low %vm2785_vm9, %vm2781_vm8 }
  0x9d   : > { %v518_v33 = vsel %vm514_vm14, 65537, %v4621_v2 }
  0x9f   : > { %v2735_v30 = vld.sshfl [vmem:[#allocation1] sm:$0xff pattern:$0x73625140]  ;;  %1243 = vrot.lane.b32.xlu0 %v1227_v15, %s2486_s25  ;;  %v340_v15 = vunpack.c.h.b16 %v331_v59 }
  0xa0   : > { %1408 = vst [vmem:[#allocation1] ss:$4 sm:$0xff] %v2624_v1  ;;  %1047 = vrot.lane.b32.xlu1 %v1031_v56, %s2484_s20  ;;  %1043 = vrot.lane.b32.xlu2 %v1027_v58, %s2484_s20  ;;  %v353_v56 = vunpack.c.l.b16 %v333_v41  ;;  %v361_v58 = vunpack.c.h.b16 %v334_v42 }
  0xa1   : > { %vm344_vm3 = vcmp.ne.s32.totalorder %v340_v15, %v2779_v55 }
  0xa2   : > { %vm357_vm10 = vcmp.ne.s32.totalorder %v353_v56, %v2776_v54  ;;  %vm365_vm13 = vcmp.ne.s32.totalorder %v361_v58, %v2779_v55  ;;  %v523_v56 = vperm.slane %v518_v33, 0 }
  0xa3   : > { %vm2813_vm1 = vmpackc.low %vm365_vm13, %vm364_vm12 }
  0xa4   : > { %v2752_v40 = vpop.permute.xlu2 %434  ;;  %v544_v15 = vunpack.c.h.b16 %v523_v56 }
  0xa6   : > { %vm548_vm13 = vcmp.ne.s32.totalorder %v544_v15, %v2779_v55 }
  0xa7   : > { %v2761_v46 = vld.sshfl [vmem:[#allocation1] sm:$0xff pattern:$0x73625140]  ;;  %v2763_v47 = vld.sshfl [vmem:[#allocation1 + $0x8] sm:$0xff pattern:$0x73625140]  ;;  %1237 = vrot.lane.b32.xlu0 %v1221_v8, %s2486_s25  ;;  %v339_v8 = vunpack.c.l.b16 %v331_v59 }
  0xa8   : > { %1631 = vrot.lane.b32.xlu1 %v1615_v37, %s2489_s28  ;;  %1441 = vrot.lane.b32.xlu2 %v2701_v45, %s2488_s27  ;;  %v1415_v48 = vld.sshfl [vmem:[#allocation1 + $0x10] sm:$0xff pattern:$0x73625140]  ;;  %v1417_v49 = vld.sshfl [vmem:[#allocation1 + $0x18] sm:$0xff pattern:$0x73625140]  ;;  %v354_v45 = vunpack.c.h.b16 %v333_v41 }
  0xa9   : > { %1458 = vst [vmem:[#allocation1] ss:$4 sm:$0xff] %v2624_v1  ;;  %vm343_vm2 = vcmp.ne.s32.totalorder %v339_v8, %v2776_v54  ;;  %v686_v41 = vld [vmem:[#allocation3 + $0x2] ss:$8 sm:$0xf]  ;;  %v543_v8 = vunpack.c.l.b16 %v523_v56 }
  0xaa   : > { %vm358_vm11 = vcmp.ne.s32.totalorder %v354_v45, %v2779_v55  ;;  %v524_v45 = vperm.slane %v518_v33, 4  ;;  %vm2850_vm9 = vmpackc.low %vm344_vm3, %vm343_vm2 }
  0xab   : > { %v2773_v53 = vpop.permute.xlu0 %244  ;;  %vm2807_vm0 = vmpackc.low %vm358_vm11, %vm357_vm10  ;;  %vm547_vm12 = vcmp.ne.s32.totalorder %v543_v8, %v2776_v54 }
  0xac   : > { %vm352_vm10 = vmpackc.low %vm351_vm7, %vm350_vm6 }
  0xad   : > { %v2794_v63 = vpop.permute.xlu2 %457  ;;  %vm2889_vm2 = vmpackc.low %vm548_vm13, %vm547_vm12 }
  0xaf   : > { %1431 = vrot.lane.b32.xlu0 %v1415_v48, %s2488_s27 }
  0xb0   : > { %1241 = vrot.lane.b32.xlu2 %v1225_v10, %s2486_s25  ;;  %1239 = vrot.lane.b32.xlu1 %v1223_v9, %s2486_s25  ;;  %v1459_v0 = vld.sshfl [vmem:[#allocation1] sm:$0xff pattern:$0x73625140]  ;;  %v497_v10 = vperm.slane %v2759_v44, 0  ;;  %v498_v9 = vperm.slane %v2759_v44, 1 }
  0xb1   : > { %1602 = vst [vmem:[#allocation1] ss:$4 sm:$0xff] %v2624_v1 }
  0xb2   : > { %vm2824_vm4 = vcmp.eq.s32.totalorder %v497_v10, 1  ;;  %vm2828_vm5 = vcmp.eq.s32.totalorder %v498_v9, 1  ;;  %v550_v10 = vunpack.c.l.b16 %v524_v45 }
  0xb3   : > { %v2811_v28 = vpop.permute.xlu1 %272  ;;  %vm513_vm8 = vmpackc.low %vm2828_vm5, %vm2824_vm4 }
  0xb4   : > { %4648 = vst [vmem:[#allocation13_spill] sm:$0xff] %v2811_v28  ;;  %v271_v32 = vpop.permute.xlu0 %270  ;;  %v517_v9 = vsel %vm513_vm8, 65537, %v4621_v2  ;;  %vm554_vm14 = vcmp.ne.s32.totalorder %v550_v10, %v2776_v54 }
  0xb5   : > { %v284_v34 = vsel %vm4613_vm15, %v2733_v22, %v271_v32  ;;  %v285_v35 = vsel %vm4613_vm15, %v271_v32, %v2811_v28  ;;  %v551_v32 = vunpack.c.h.b16 %v524_v45  ;;  %v522_v36 = vperm.slane %v517_v9, 4 }
  0xb6   : > { %v397_v42 = vsel %vm2807_vm0, %v284_v34, 0  ;;  %v398_v48 = vsel %vm2813_vm1, %v285_v35, 0  ;;  %v521_v34 = vperm.slane %v517_v9, 0  ;;  %v877_v35 = vld [vmem:[#allocation3 + $0x3] ss:$8 sm:$0xf0] }
  0xb7   : > { %1461 = vrot.lane.b32.xlu0 %v1459_v0, %s2488_s27  ;;  %v413_v51 = vunpack.c.l.b16 %v397_v42  ;;  %v414_v52 = vunpack.c.l.b16 %v398_v48  ;;  %vm555_vm0 = vcmp.ne.s32.totalorder %v551_v32, %v2779_v55  ;;  %vm4615_vm1 = vcmask 130048  }
  0xb8   : > { %1249 = vrot.lane.b32.xlu2 %v2688_v39, %s2486_s25  ;;  %1433 = vrot.lane.b32.xlu1 %v1417_v49, %s2488_s27  ;;  %v1609_v57 = vld.sshfl [vmem:[#allocation1 + $0x10] sm:$0xff pattern:$0x73625140]  ;;  %v1611_v58 = vld.sshfl [vmem:[#allocation1 + $0x18] sm:$0xff pattern:$0x73625140]  ;;  %v688_v49 = vor.u32 %v687_v50, %v686_v41  ;;  %vm2896_vm3 = vmpackc.low %vm555_vm0, %vm554_vm14 }
  0xb9   : > { %v420_v59 = vpack.c.b16 %v414_v52, %v413_v51  ;;  %v2854_v61 = vld.sshfl [vmem:[#allocation1 + $0x8] sm:$0xff pattern:$0x73625140]  ;;  %v2856_v39 = vld.sshfl [vmem:[#allocation1] sm:$0xff pattern:$0x73625140]  ;;  %v529_v51 = vunpack.c.l.b16 %v521_v34  ;;  %v530_v52 = vunpack.c.h.b16 %v521_v34 }
  0xba   : > { %v2858_v62 = vpop.permute.xlu2 %1051  ;;  %1652 = vst [vmem:[#allocation1] ss:$4 sm:$0xff] %v2624_v1  ;;  %vm689_vm11 = vcmp.ne.f32.partialorder %v688_v49, 0.0 }
  0xbb   : > { %428 = vst [vmem:[#allocation2 + $0x8] sm:$0x33] %v420_v59  ;;  %v267_v0 = vpop.permute.xlu1 %266  ;;  %v2882_v37 = vsel %vm689_vm11, 1, %v4621_v2  ;;  %v537_v59 = vunpack.c.h.b16 %v522_v36  ;;  %vm533_vm7 = vcmp.ne.s32.totalorder %v529_v51, %v2776_v54  ;;  %vm534_vm8 = vcmp.ne.s32.totalorder %v530_v52, %v2779_v55 }
  0xbc   : > { %v283_v20 = vsel %vm4613_vm15, %v267_v0, %v2733_v22  ;;  %v300_v31 = vsel %vm4613_vm15, %v2773_v53, %v267_v0  ;;  %v876_v22 = vld [vmem:[#allocation3 + $0x3] ss:$8 sm:$0xf]  ;;  %v691_v41 = vperm.slane %v2882_v37, 0  ;;  %v693_v60 = vperm.slane %v2882_v37, 2  ;;  %vm2938_vm12 = vmpackc.low %vm534_vm8, %vm533_vm7 }
  0xbd   : > { %v395_v21 = vsel %vm2850_vm9, %v300_v31, 0  ;;  %v396_v23 = vsel %vm352_vm10, %v283_v20, 0  ;;  %v878_v48 = vor.u32 %v877_v35, %v876_v22  ;;  %v694_v8 = vperm.slane %v2882_v37, 3 }
  0xbe   : > { %v411_v1 = vunpack.c.l.b16 %v395_v21  ;;  %v412_v33 = vunpack.c.l.b16 %v396_v23  ;;  %vm2908_vm4 = vcmp.eq.s32.totalorder %v691_v41, 1  ;;  %vm541_vm10 = vcmp.ne.s32.totalorder %v537_v59, %v2779_v55 }
  0xbf   : > { %1625 = vrot.lane.b32.xlu0 %v1609_v57, %s2489_s28  ;;  %v536_v57 = vunpack.c.l.b16 %v522_v36  ;;  %vm879_vm6 = vcmp.ne.f32.partialorder %v878_v48, 0.0  ;;  %vm2942_vm13 = vcmp.eq.s32.totalorder %v693_v60, 1  ;;  %vm2946_vm14 = vcmp.eq.s32.totalorder %v694_v8, 1  ;;  %v1085_v48 = vld [vmem:[#allocation3 + $0x5] ss:$8 sm:$0xf] }
  0xc0   : > { %1429 = vrot.lane.b32.xlu2 %v2763_v47, %s2488_s27  ;;  %1427 = vrot.lane.b32.xlu1 %v2761_v46, %s2488_s27  ;;  %v419_v53 = vpack.c.b16 %v412_v33, %v411_v1  ;;  %v692_v46 = vperm.slane %v2882_v37, 1 }
  0xc1   : > { %vm540_vm9 = vcmp.ne.s32.totalorder %v536_v57, %v2776_v54 }
  0xc2   : > { %427 = vst [vmem:[#allocation2] sm:$0x33] %v419_v53  ;;  %v2885_v42 = vpop.permute.xlu2 %628  ;;  %vm2916_vm5 = vcmp.eq.s32.totalorder %v692_v46, 1  ;;  %vm542_vm0 = vmpackc.low %vm541_vm10, %vm540_vm9 }
  0xc3   : > { %vm707_vm11 = vmpackc.low %vm2916_vm5, %vm2908_vm4 }
  0xc4   : > { %v2900_v56 = vpop.permute.xlu1 %461  ;;  %v460_v45 = vpop.permute.xlu0 %459  ;;  %v711_v22 = vsel %vm707_vm11, 65537, %v4621_v2 }
  0xc5   : > { %v473_v49 = vsel %vm4615_vm1, %v2794_v63, %v460_v45  ;;  %v474_v0 = vsel %vm4615_vm1, %v460_v45, %v2900_v56  ;;  %v715_v52 = vperm.slane %v711_v22, 0  ;;  %v716_v45 = vperm.slane %v711_v22, 4 }
  0xc6   : > { %v587_v10 = vsel %vm2889_vm2, %v473_v49, 0  ;;  %v588_v9 = vsel %vm2896_vm3, %v474_v0, 0  ;;  %vm708_vm2 = vmpackc.low %vm2946_vm14, %vm2942_vm13  ;;  %vm4612_vm14 = vcmask 121856  }
  0xc7   : > { %1627 = vrot.lane.b32.xlu0 %v1611_v58, %s2489_s28  ;;  %v603_v31 = vunpack.c.l.b16 %v587_v10  ;;  %v604_v32 = vunpack.c.l.b16 %v588_v9  ;;  %v2934_v58 = vsel %vm879_vm6, 1, %v4621_v2  ;;  %v724_v15 = vunpack.c.h.b16 %v715_v52  ;;  %v1653_v10 = vld.sshfl [vmem:[#allocation1] sm:$0xff pattern:$0x73625140] }
  0xc8   : > { %465 = vrot.lane.b32.xlu2 %v2643_v12, %s2483_s7  ;;  %1271 = vrot.lane.b32.xlu1 %v2735_v30, %s2486_s25  ;;  %4665 = vst [vmem:[#allocation14_spill] sm:$0xff] %v2934_v58  ;;  %v881_v35 = vperm.slane %v2934_v58, 0  ;;  %v882_v53 = vperm.slane %v2934_v58, 1  ;;  %v730_v20 = vunpack.c.l.b16 %v716_v45  ;;  %v884_v12 = vperm.slane %v2934_v58, 3 }
  0xc9   : > { %v610_v21 = vpack.c.b16 %v604_v32, %v603_v31  ;;  %v731_v31 = vunpack.c.h.b16 %v716_v45  ;;  %vm728_vm8 = vcmp.ne.s32.totalorder %v724_v15, %v2779_v55 }
  0xca   : > { %v2936_v23 = vpop.permute.xlu2 %651  ;;  %vm2970_vm3 = vcmp.eq.s32.totalorder %v881_v35, 1  ;;  %vm2974_vm4 = vcmp.eq.s32.totalorder %v882_v53, 1  ;;  %vm734_vm9 = vcmp.ne.s32.totalorder %v730_v20, %v2776_v54 }
  0xcb   : > { %v614_v33 = vrot.slane %v610_v21, 6  ;;  %vm897_vm5 = vmpackc.low %vm2974_vm4, %vm2970_vm3  ;;  %v883_v21 = vperm.slane %v2934_v58, 2  ;;  %vm735_vm10 = vcmp.ne.s32.totalorder %v731_v31, %v2779_v55 }
  0xcc   : > { %v456_v34 = vpop.permute.xlu0 %455  ;;  %v901_v30 = vsel %vm897_vm5, 65537, %v4621_v2  ;;  %vm3021_vm3 = vmpackc.low %vm735_vm10, %vm734_vm9 }
  0xcd   : > { %622 = vst [vmem:[#allocation2 + $0x8] sm:$0xcc] %v614_v33  ;;  %v472_v36 = vsel %vm4615_vm1, %v456_v34, %v2794_v63  ;;  %v489_v41 = vsel %vm4615_vm1, %v2752_v40, %v456_v34  ;;  %v1086_v63 = vld [vmem:[#allocation3 + $0x5] ss:$8 sm:$0xf0]  ;;  %v712_v40 = vsel %vm708_vm2, 65537, %v4621_v2 }
  0xce   : > { %v585_v47 = vsel %vm2938_vm12, %v489_v41, 0  ;;  %v586_v46 = vsel %vm542_vm0, %v472_v36, 0  ;;  %v717_v8 = vperm.slane %v712_v40, 0  ;;  %v718_v9 = vperm.slane %v712_v40, 4 }
  0xcf   : > { %1621 = vrot.lane.b32.xlu0 %v2856_v39, %s2489_s28  ;;  %v601_v50 = vunpack.c.l.b16 %v585_v47  ;;  %v602_v51 = vunpack.c.l.b16 %v586_v46  ;;  %v906_v35 = vperm.slane %v901_v30, 4  ;;  %vm3000_vm11 = vcmp.eq.s32.totalorder %v883_v21, 1  ;;  %v1663_v46 = vld [vmem:[#allocation3 + $0x40] ss:$8 sm:$0xf] }
  0xd0   : > { %849 = vrot.lane.b32.xlu2 %v2668_v25, %s2487_s26  ;;  %1623 = vrot.lane.b32.xlu1 %v2854_v61, %s2489_s28  ;;  %v1087_v25 = vor.u32 %v1086_v63, %v1085_v48  ;;  %v723_v61 = vunpack.c.l.b16 %v715_v52  ;;  %v737_v1 = vunpack.c.l.b16 %v717_v8  ;;  %v738_v33 = vunpack.c.h.b16 %v717_v8  ;;  %v1664_v48 = vld [vmem:[#allocation3 + $0x40] ss:$8 sm:$0xf0]  ;;  %v1280_v8 = vld [vmem:[#allocation3 + $0x6] ss:$8 sm:$0xf0] }
  0xd1   : > { %v2978_v39 = vpop.permute.xlu1 %1055  ;;  %v609_v60 = vpack.c.b16 %v602_v51, %v601_v50  ;;  %v744_v34 = vunpack.c.l.b16 %v718_v9  ;;  %v745_v22 = vunpack.c.h.b16 %v718_v9  ;;  %vm3004_vm12 = vcmp.eq.s32.totalorder %v884_v12, 1 }
  0xd2   : > { %v2980_v49 = vpop.permute.xlu2 %1435  ;;  %vm1088_vm6 = vcmp.ne.f32.partialorder %v1087_v25, 0.0  ;;  %vm727_vm7 = vcmp.ne.s32.totalorder %v723_v61, %v2776_v54  ;;  %vm741_vm0 = vcmp.ne.s32.totalorder %v737_v1, %v2776_v54  ;;  %vm742_vm2 = vcmp.ne.s32.totalorder %v738_v33, %v2779_v55 }
  0xd3   : > { %4676 = vst [vmem:[#allocation15_spill] sm:$0xff] %v2980_v49  ;;  %v613_v0 = vrot.slane %v609_v60, 6  ;;  %v3009_v36 = vsel %vm1088_vm6, 1, %v4621_v2  ;;  %vm3015_vm13 = vmpackc.low %vm728_vm8, %vm727_vm7  ;;  %vm748_vm4 = vcmp.ne.s32.totalorder %v744_v34, %v2776_v54  ;;  %vm749_vm5 = vcmp.ne.s32.totalorder %v745_v22, %v2779_v55  ;;  %v1469_v22 = vld [vmem:[#allocation3 + $0x7] ss:$8 sm:$0xf] }
  0xd4   : > { %v905_v51 = vperm.slane %v901_v30, 0  ;;  %vm898_vm6 = vmpackc.low %vm3004_vm12, %vm3000_vm11  ;;  %v1096_v52 = vperm.slane %v3009_v36, 6  ;;  %v920_v40 = vunpack.c.l.b16 %v906_v35  ;;  %v921_v45 = vunpack.c.h.b16 %v906_v35  ;;  %v1470_v35 = vld [vmem:[#allocation3 + $0x7] ss:$8 sm:$0xf0] }
  0xd5   : > { %621 = vst [vmem:[#allocation2] sm:$0xcc] %v613_v0  ;;  %v2986_v32 = vpop.permute.xlu0 %653  ;;  %v1097_v57 = vperm.slane %v3009_v36, 7  ;;  %v1665_v59 = vor.u32 %v1664_v48, %v1663_v46  ;;  %vm4614_vm7 = vcmask 7168   ;;  %v1092_v0 = vperm.slane %v3009_v36, 2  ;;  %vm3042_vm8 = vmpackc.low %vm742_vm2, %vm741_vm0 }
  0xd6   : > { %v667_v61 = vsel %vm4612_vm14, %v2936_v23, %v2986_v32  ;;  %v913_v9 = vunpack.c.l.b16 %v905_v51  ;;  %vm3067_vm9 = vcmp.eq.s32.totalorder %v1096_v52, 1  ;;  %vm3075_vm10 = vmpackc.low %vm749_vm5, %vm748_vm4  ;;  %vm924_vm11 = vcmp.ne.s32.totalorder %v920_v40, %v2776_v54 }
  0xd7   : > { %467 = vrot.lane.b32.xlu0 %v2645_v13, %s2483_s7  ;;  %vm925_vm12 = vcmp.ne.s32.totalorder %v921_v45, %v2779_v55  ;;  %vm3085_vm0 = vcmp.eq.s32.totalorder %v1097_v57, 1  ;;  %v1093_v33 = vperm.slane %v3009_v36, 3  ;;  %vm3108_vm5 = vcmp.eq.s32.totalorder %v1092_v0, 1  ;;  %v1279_v0 = vld [vmem:[#allocation3 + $0x6] ss:$8 sm:$0xf] }
  0xd8   : > { %469 = vrot.lane.b32.xlu1 %v2647_v14, %s2483_s7  ;;  %1655 = vrot.lane.b32.xlu2 %v1653_v10, %s2489_s28  ;;  %v3061_v10 = vsel %vm898_vm6, 65537, %v4621_v2  ;;  %vm3097_vm2 = vmpackc.low %vm925_vm12, %vm924_vm11  ;;  %v1091_v40 = vperm.slane %v3009_v36, 1  ;;  %v1471_v45 = vor.u32 %v1470_v35, %v1469_v22 }
  0xd9   : > { %vm3114_vm6 = vcmp.eq.s32.totalorder %v1093_v33, 1  ;;  %v908_v20 = vperm.slane %v3061_v10, 4 }
  0xda   : > { %v3011_v14 = vpop.permute.xlu1 %1245  ;;  %v3013_v41 = vpop.permute.xlu2 %841  ;;  %vm1472_vm12 = vcmp.ne.f32.partialorder %v1471_v45, 0.0 }
  0xdb   : > { %4681 = vst [vmem:[#allocation16_spill] sm:$0xff] %v3011_v14  ;;  %v3169_v33 = vsel %vm1472_vm12, 1, %v4621_v2  ;;  %v935_v52 = vunpack.c.h.b16 %v908_v20 }
  0xdc   : > { %v1481_v53 = vperm.slane %v3169_v33, 7 }
  0xdd   : > { %v650_v63 = vpop.permute.xlu0 %649 }
  0xde   : > { %v666_v60 = vsel %vm4612_vm14, %v650_v63, %v2936_v23  ;;  %v683_v25 = vsel %vm4612_vm14, %v2885_v42, %v650_v63  ;;  %v1090_v63 = vperm.slane %v3009_v36, 0  ;;  %vm3214_vm12 = vcmp.eq.s32.totalorder %v1481_v53, 1 }
  0xdf   : > { %851 = vrot.lane.b32.xlu0 %v2670_v26, %s2487_s26  ;;  %v779_v42 = vsel %vm3015_vm13, %v683_v25, 0  ;;  %v780_v15 = vsel %vm3021_vm3, %v666_v60, 0  ;;  %vm1666_vm13 = vcmp.ne.f32.partialorder %v1665_v59, 0.0  ;;  %vm917_vm3 = vcmp.ne.s32.totalorder %v913_v9, %v2776_v54 }
  0xe0   : > { %853 = vrot.lane.b32.xlu1 %v2672_v27, %s2487_s26  ;;  %276 = vrot.lane.b32.xlu2 %v2630_v4, %s2482_s23  ;;  %v795_v26 = vunpack.c.l.b16 %v779_v42  ;;  %v796_v23 = vunpack.c.l.b16 %v780_v15  ;;  %v914_v4 = vunpack.c.h.b16 %v905_v51  ;;  %v781_v27 = vsel %vm3042_vm8, %v667_v61, 0  ;;  %vm1109_vm8 = vmpackc.low %vm3085_vm0, %vm3067_vm9 }
  0xe1   : > { %v3105_v46 = vsel %vm1666_vm13, 1, %v4621_v2  ;;  %vm3141_vm11 = vcmp.eq.s32.totalorder %v1090_v63, 1  ;;  %vm1107_vm13 = vmpackc.low %vm3114_vm6, %vm3108_vm5  ;;  %v1113_v31 = vsel %vm1109_vm8, 65537, %v4621_v2 }
  0xe2   : > { %v3083_v21 = vpop.permute.xlu1 %655  ;;  %v803_v12 = vpack.c.b16 %v796_v23, %v795_v26  ;;  %v840_v30 = vpop.permute.xlu2 %839  ;;  %vm918_vm4 = vcmp.ne.s32.totalorder %v914_v4, %v2779_v55  ;;  %v1674_v60 = vperm.slane %v3105_v46, 6  ;;  %v1675_v25 = vperm.slane %v3105_v46, 7 }
  0xe3   : > { %v668_v34 = vsel %vm4612_vm14, %v2986_v32, %v3083_v21  ;;  %v856_v47 = vsel %vm4614_vm7, %v840_v30, %v3013_v41  ;;  %v797_v32 = vunpack.c.l.b16 %v781_v27  ;;  %v1281_v23 = vor.u32 %v1280_v8, %v1279_v0 }
  0xe4   : > { %v782_v13 = vsel %vm3075_vm10, %v668_v34, 0  ;;  %811 = vst [vmem:[#allocation2 + $0x20] sm:$0x33] %v803_v12  ;;  %v970_v59 = vsel %vm3097_vm2, %v856_v47, 0  ;;  %vm919_vm10 = vmpackc.low %vm918_vm4, %vm917_vm3  ;;  %vm3150_vm2 = vcmp.eq.s32.totalorder %v1091_v40, 1  ;;  %vm3160_vm3 = vcmp.eq.s32.totalorder %v1674_v60, 1 }
  0xe5   : > { %v798_v48 = vunpack.c.l.b16 %v782_v13  ;;  %v986_v42 = vunpack.c.l.b16 %v970_v59  ;;  %vm3164_vm4 = vcmp.eq.s32.totalorder %v1675_v25, 1  ;;  %v3172_v34 = vsel %vm1107_vm13, 65537, %v4621_v2  ;;  %vm1106_vm9 = vmpackc.low %vm3150_vm2, %vm3141_vm11 }
  0xe6   : > { %v3112_v51 = vpop.permute.xlu0 %843  ;;  %v1120_v35 = vperm.slane %v1113_v31, 0  ;;  %vm1687_vm0 = vmpackc.low %vm3164_vm4, %vm3160_vm3  ;;  %vm1282_vm5 = vcmp.ne.f32.partialorder %v1281_v23, 0.0  ;;  %vm939_vm3 = vcmp.ne.s32.totalorder %v935_v52, %v2779_v55  ;;  %v1116_v60 = vperm.slane %v3172_v34, 0 }
  0xe7   : > { %v804_v57 = vpack.c.b16 %v798_v48, %v797_v32  ;;  %278 = vrot.lane.b32.xlu0 %v2632_v5, %s2482_s23  ;;  %v907_v5 = vperm.slane %v3061_v10, 0  ;;  %v1480_v10 = vperm.slane %v3169_v33, 6  ;;  %v3196_v32 = vsel %vm1106_vm9, 65537, %v4621_v2 }
  0xe8   : > { %280 = vrot.lane.b32.xlu1 %v2634_v6, %s2482_s23  ;;  %659 = vrot.lane.b32.xlu2 %v2655_v17, %s2485_s24  ;;  %v3206_v63 = vsel %vm1282_vm5, 1, %v4621_v2  ;;  %v1164_v40 = vunpack.c.l.b16 %v1120_v35  ;;  %v1165_v45 = vunpack.c.h.b16 %v1120_v35  ;;  %v1114_v59 = vperm.slane %v3196_v32, 0 }
  0xe9   : > { %812 = vst [vmem:[#allocation2 + $0x28] sm:$0x33] %v804_v57  ;;  %v928_v22 = vunpack.c.h.b16 %v907_v5  ;;  %v1121_v57 = vperm.slane %v1113_v31, 4  ;;  %vm3210_vm11 = vcmp.eq.s32.totalorder %v1480_v10, 1  ;;  %v1672_v35 = vperm.slane %v3105_v46, 4 }
  0xea   : > { %v819_v61 = vpop.permute.xlu1 %818  ;;  %v3139_v6 = vpop.permute.xlu2 %1057  ;;  %vm1168_vm4 = vcmp.ne.s32.totalorder %v1164_v40, %v2776_v54  ;;  %vm1169_vm9 = vcmp.ne.s32.totalorder %v1165_v45, %v2779_v55  ;;  %v1673_v10 = vperm.slane %v3105_v46, 5  ;;  %v1290_v52 = vperm.slane %v3206_v63, 6 }
  0xeb   : > { %v873_v15 = vsel %vm4614_vm7, %v819_v61, %v840_v30  ;;  %v927_v30 = vunpack.c.l.b16 %v907_v5  ;;  %vm932_vm8 = vcmp.ne.s32.totalorder %v928_v22, %v2779_v55  ;;  %v1286_v5 = vperm.slane %v3206_v63, 2 }
  0xec   : > { %v969_v9 = vsel %vm919_vm10, %v873_v15, 0  ;;  %vm4616_vm10 = vcmask 1039360   ;;  %v1287_v61 = vperm.slane %v3206_v63, 3  ;;  %v1171_v26 = vunpack.c.l.b16 %v1121_v57 }
  0xed   : > { %v985_v12 = vunpack.c.l.b16 %v969_v9  ;;  %vm931_vm6 = vcmp.ne.s32.totalorder %v927_v30, %v2776_v54  ;;  %v1172_v23 = vunpack.c.h.b16 %v1121_v57  ;;  %v3250_v9 = vunpack.c.h.b16 %v1114_v59 }
  0xee   : > { %v3181_v13 = vpop.permute.xlu0 %1633  ;;  %vm3225_vm13 = vmpackc.low %vm932_vm8, %vm931_vm6  ;;  %vm3262_vm6 = vcmp.eq.s32.totalorder %v1286_v5, 1  ;;  %vm3266_vm8 = vcmp.eq.s32.totalorder %v1287_v61, 1  ;;  %v1066_v30 = vsel %vm4616_vm10, %v2978_v39, %v3139_v6  ;;  %v1291_v40 = vperm.slane %v3206_v63, 7 }
  0xef   : > { %v993_v1 = vpack.c.b16 %v986_v42, %v985_v12  ;;  %661 = vrot.lane.b32.xlu0 %v2657_v18, %s2485_s24  ;;  %v1117_v18 = vperm.slane %v3172_v34, 4  ;;  %v857_v42 = vsel %vm4614_vm7, %v3013_v41, %v3112_v51  ;;  %v3248_v41 = vunpack.c.l.b16 %v1114_v59 }
  0xf0   : > { %663 = vrot.lane.b32.xlu1 %v2659_v19, %s2485_s24  ;;  %1053 = vrot.lane.b32.xlu2 %v2677_v29, %s2484_s20  ;;  %v934_v19 = vunpack.c.l.b16 %v908_v20  ;;  %v3203_v29 = vsel %vm1687_vm0, 65537, %v4621_v2  ;;  %vm1493_vm0 = vmpackc.low %vm3214_vm12, %vm3210_vm11  ;;  %v1115_v59 = vperm.slane %v3196_v32, 4  ;;  %v1284_v32 = vperm.slane %v3206_v63, 0  ;;  %s2077_s20 = sshll.u32 %s232_s14, 4  ;;  %s2078_s20 = int_to_ptr.vmem [resolvable:$true] %s2077_s20 }
  0xf1   : > { %v997_v47 = vrot.slane %v993_v1, 6  ;;  %v3218_v0 = vunpack.c.l.b16 %v1117_v18  ;;  %v1698_v8 = vperm.slane %v3203_v29, 0  ;;  %v3232_v15 = vunpack.c.h.b16 %v1117_v18  ;;  %vm1301_vm11 = vmpackc.low %vm3266_vm8, %vm3262_vm6 }
  0xf2   : > { %v3198_v48 = vpop.permute.xlu1 %1629  ;;  %v3200_v50 = vpop.permute.xlu2 %1049  ;;  %vm938_vm2 = vcmp.ne.s32.totalorder %v934_v19, %v2776_v54  ;;  %v3295_v22 = vsel %vm1493_vm0, 65537, %v4621_v2  ;;  %vm1126_vm12 = vcmp.ne.s32.totalorder %v3248_v41, %v2776_v54  ;;  %vm3321_vm0 = vcmp.eq.s32.totalorder %v1672_v35, 1 }
  0xf3   : > { %1005 = vst [vmem:[#allocation2 + $0x20] sm:$0xcc] %v997_v47  ;;  %vm3254_vm5 = vmpackc.low %vm939_vm3, %vm938_vm2  ;;  %v3260_v27 = vunpack.c.l.b16 %v1698_v8  ;;  %vm1147_vm2 = vcmp.ne.s32.totalorder %v3218_v0, %v2776_v54  ;;  %vm1148_vm3 = vcmp.ne.s32.totalorder %v3232_v15, %v2779_v55  ;;  %v3302_v47 = vunpack.c.h.b16 %v1698_v8 }
  0xf4   : > { %v1504_v57 = vperm.slane %v3295_v22, 0  ;;  %v1305_v61 = vsel %vm1301_vm11, 65537, %v4621_v2  ;;  %v1285_v17 = vperm.slane %v3206_v63, 1  ;;  %vm1127_vm6 = vcmp.ne.s32.totalorder %v3250_v9, %v2779_v55 }
  0xf5   : > { %vm3352_vm11 = vcmp.eq.s32.totalorder %v1291_v40, 1  ;;  %vm1746_vm14 = vcmp.ne.s32.totalorder %v3260_v27, %v2776_v54  ;;  %vm1747_vm15 = vcmp.ne.s32.totalorder %v3302_v47, %v2779_v55  ;;  %v3364_v31 = vunpack.c.h.b16 %v1115_v59 }
  0xf6   : > { %v3378_v35 = vunpack.c.h.b16 %v1116_v60  ;;  %vm3386_vm1 = vcmp.eq.s32.totalorder %v1284_v32, 1  ;;  %v3395_v40 = vunpack.c.h.b16 %v1504_v57  ;;  %v1476_v9 = vperm.slane %v3169_v33, 2 }
  0xf7   : > { %1437 = vrot.lane.b32.xlu0 %v2699_v43, %s2488_s27  ;;  %v971_v43 = vsel %vm3225_vm13, %v857_v42, 0  ;;  %vm3274_vm13 = vmpackc.low %vm1169_vm9, %vm1168_vm4  ;;  %vm1175_vm4 = vcmp.ne.s32.totalorder %v1171_v26, %v2776_v54  ;;  %vm1176_vm9 = vcmp.ne.s32.totalorder %v1172_v23, %v2779_v55  ;;  %v3360_v26 = vunpack.c.l.b16 %v1504_v57 }
  0xf8   : > { %1247 = vrot.lane.b32.xlu1 %v2686_v38, %s2486_s25  ;;  %463 = vrot.lane.b32.xlu2 %v2641_v11, %s2483_s7  ;;  %v987_v18 = vunpack.c.l.b16 %v971_v43  ;;  %vm3344_vm8 = vmpackc.low %vm1176_vm9, %vm1175_vm4  ;;  %v3362_v23 = vunpack.c.l.b16 %v1115_v59  ;;  %vm3390_vm9 = vcmp.eq.s32.totalorder %v1285_v17, 1  ;;  %v1063_v57 = vsel %vm4616_vm10, %v3200_v50, %v2858_v62  ;;  %s2076_s7 = scalar_lea.hbm %s4611_s4, %s2275_s19  ;;  %s2064_s25 = scalar_lea.sflag [#allocation5], %s2612_s9 }
  0xf9   : > { %v3258_v4 = vpop.permute.xlu0 %1045  ;;  %v1477_v34 = vperm.slane %v3169_v33, 3 }
  0xfa   : > { %v3285_v20 = vpop.permute.xlu1 %845  ;;  %v3287_v1 = vpop.permute.xlu2 %1043 }
  0xfb   : > { %4722 = vst [vmem:[#allocation17_spill] sm:$0xff] %v3285_v20  ;;  %v858_v53 = vsel %vm4614_vm7, %v3112_v51, %v3285_v20  ;;  %v1184_v51 = vsel %vm3274_vm13, %v1066_v30, 0  ;;  %vm3348_vm13 = vcmp.eq.s32.totalorder %v1290_v52, 1  ;;  %v3376_v30 = vunpack.c.l.b16 %v1116_v60 }
  0xfc   : > { %v972_v19 = vsel %vm3254_vm5, %v858_v53, 0  ;;  %vm3325_vm5 = vcmp.eq.s32.totalorder %v1673_v10, 1  ;;  %v1200_v42 = vunpack.c.l.b16 %v1184_v51  ;;  %v1310_v10 = vperm.slane %v1305_v61, 0  ;;  %vm1303_vm7 = vmpackc.low %vm3352_vm11, %vm3348_vm13 }
  0xfd   : > { %v988_v45 = vunpack.c.l.b16 %v972_v19  ;;  %vm1686_vm4 = vmpackc.low %vm3325_vm5, %vm3321_vm0  ;;  %v1474_v19 = vperm.slane %v3169_v33, 0  ;;  %vm1133_vm0 = vcmp.ne.s32.totalorder %v3362_v23, %v2776_v54  ;;  %vm1134_vm5 = vcmp.ne.s32.totalorder %v3364_v31, %v2779_v55 }
  0xfe   : > { %v1690_v51 = vsel %vm1686_vm4, 65537, %v4621_v2  ;;  %v1311_v60 = vperm.slane %v1305_v61, 4  ;;  %vm1140_vm4 = vcmp.ne.s32.totalorder %v3376_v30, %v2776_v54  ;;  %v1330_v0 = vunpack.c.l.b16 %v1310_v10 }
  0xff   : > { %v994_v5 = vpack.c.b16 %v988_v45, %v987_v18  ;;  %847 = vrot.lane.b32.xlu0 %v2666_v24, %s2487_s26  ;;  %v1475_v45 = vperm.slane %v3169_v33, 1  ;;  %v1331_v15 = vunpack.c.h.b16 %v1310_v10  ;;  %v3431_v8 = vsel %vm1303_vm7, 65537, %v4621_v2 }
 0x100   : > { %274 = vrot.lane.b32.xlu1 %v2628_v3, %s2482_s23  ;;  %657 = vrot.lane.b32.xlu2 %v2653_v16, %s2485_s24  ;;  %v1060_v61 = vsel %vm4616_vm10, %v3287_v1, %v3258_v4  ;;  %v1696_v32 = vperm.slane %v1690_v51, 0  ;;  %v1697_v17 = vperm.slane %v1690_v51, 4  ;;  %vm3450_vm13 = vcmp.eq.s32.totalorder %v1474_v19, 1  ;;  %s2079_s24 = sshll.u32 %s2076_s7, 4  ;;  %s2080_s24 = int_to_ptr.hbm [resolvable:$true] %s2079_s24 }
 0x101   : > { %v998_v3 = vrot.slane %v994_v5, 6  ;;  %v1078_v16 = vpop.permute.xlu0 %1077  ;;  %vm3506_vm7 = vcmp.eq.s32.totalorder %v1477_v34, 1  ;;  %v1505_v20 = vperm.slane %v3295_v22, 4  ;;  %s2421_s26 = sshra.s32 %s2080_s24, 4  ;;  %s2422_s26 = int_to_ptr.hbm [resolvable:$true] %s2421_s26 }
 0x102   : > { %v3370_v38 = vpop.permute.xlu1 %1635  ;;  %v3372_v11 = vpop.permute.xlu2 %1441  ;;  %v1082_v12 = vsel %vm4616_vm10, %v3139_v6, %v1078_v16  ;;  %v1338_v16 = vunpack.c.h.b16 %v1311_v60  ;;  %v1314_v6 = vperm.slane %v3431_v8, 0  ;;  %v3474_v19 = vunpack.c.l.b16 %v1696_v32  ;;  %s2423_s27 = scalar_lea.hbm %s2422_s26, 32  ;;  %p2428_p5 = scmp.lt.s32.totalorder %s2422_s26, %s4611_s4 }
 0x103   : > { %1006 = vst [vmem:[#allocation2 + $0x28] sm:$0xcc] %v998_v3  ;;  %v1185_v53 = vsel %vm3344_vm8, %v1082_v12, 0  ;;  %vm3410_vm8 = vmpackc.low %vm1148_vm3, %vm1147_vm2  ;;  %v1337_v3 = vunpack.c.l.b16 %v1311_v60  ;;  %v3478_v51 = vunpack.c.l.b16 %v1697_v17  ;;  %vm3502_vm10 = vcmp.eq.s32.totalorder %v1476_v9, 1  ;;  %p2424_p1 = scmp.ne.s32.totalorder %s2422_s26, %s2423_s27  ;;  %p2429_p6 = scmp.lt.s32.totalorder %s2427_s30, %s2423_s27 }
 0x104   : > { %v1201_v52 = vunpack.c.l.b16 %v1185_v53  ;;  %vm1300_vm3 = vmpackc.low %vm3390_vm9, %vm3386_vm1  ;;  %vm3454_vm1 = vcmp.eq.s32.totalorder %v1475_v45, 1  ;;  %v1181_v43 = vsel %vm3410_vm8, %v1063_v57, 0  ;;  %v3480_v45 = vunpack.c.h.b16 %v1697_v17  ;;  %v3527_v17 = vld [vmem:[#allocation2 + $0x20] sm:$0xf0] }
 0x105   : > { %vm3443_vm2 = vmpackc.low %vm1127_vm6, %vm1126_vm12  ;;  %v1304_v12 = vsel %vm1300_vm3, 65537, %v4621_v2  ;;  %vm1334_vm12 = vcmp.ne.s32.totalorder %v1330_v0, %v2776_v54  ;;  %vm1335_vm6 = vcmp.ne.s32.totalorder %v1331_v15, %v2779_v55  ;;  %v3486_v59 = vunpack.c.l.b16 %v1181_v43  ;;  %4755 = vst [vmem:[#allocation19_spill] sm:$0xff] %v3527_v17  ;;  %v3561_v0 = vld [vmem:[#allocation2] sm:$0xf]  ;;  %v3563_v15 = vld [vmem:[#allocation2 + $0x4] sm:$0xf]  ;;  %p2425_p3 = pnand %p2424_p1, %p2577_p12  ;;  %p2430_p7 = por %p2429_p6, %p2428_p5 }
 0x106   : > { %v1205_v25 = vpack.c.b16 %v1201_v52, %v1200_v42  ;;  %v1178_v10 = vsel %vm3443_vm2, %v1060_v61, 0  ;;  %v3476_v52 = vunpack.c.h.b16 %v1696_v32  ;;  %vm1490_vm11 = vmpackc.low %vm3454_vm1, %vm3450_vm13  ;;  %v1308_v60 = vperm.slane %v1304_v12, 0  ;;  %v3525_v32 = vld [vmem:[#allocation2 + $0x1c] sm:$0xf0]  ;;  %4758 = vst [vmem:[#allocation20_spill] sm:$0xff] %v3561_v0 }
 0x107   : > { %vm3494_vm9 = vmpackc.low %vm1747_vm15, %vm1746_vm14  ;;  %vm4752_vm15 = vcmask 908288   ;;  %vm1341_vm8 = vcmp.ne.s32.totalorder %v1337_v3, %v2776_v54  ;;  %vm1342_vm3 = vcmp.ne.s32.totalorder %v1338_v16, %v2779_v55  ;;  %v1309_v61 = vperm.slane %v1304_v12, 4  ;;  %4759 = vst [vmem:[#allocation21_spill] sm:$0xff] %v3563_v15  ;;  %v3681_v3 = vld [vmem:[#allocation2 + $0x8] sm:$0xf]  ;;  %p2426_p11 = pneg %p2425_p3 }
 0x108   : > { %v1209_v24 = vrot.slane %v1205_v25, 6  ;;  %v1644_v47 = vsel %vm4752_vm15, %v3181_v13, %v3370_v38  ;;  %vm3519_vm14 = vmpackc.low %vm1134_vm5, %vm1133_vm0  ;;  %v3537_v31 = vunpack.c.l.b16 %v1314_v6  ;;  %v3539_v9 = vunpack.c.h.b16 %v1314_v6 }
 0x109   : > { %v3462_v1 = vpop.permute.xlu0 %1251  ;;  %vm3533_vm15 = vmpackc.low %vm1335_vm6, %vm1334_vm12  ;;  %v3547_v34 = vsel %vm1490_vm11, 65537, %v4621_v2  ;;  %vm1732_vm0 = vcmp.ne.s32.totalorder %v3474_v19, %v2776_v54  ;;  %vm1733_vm5 = vcmp.ne.s32.totalorder %v3476_v52, %v2779_v55  ;;  %vm1739_vm12 = vcmp.ne.s32.totalorder %v3478_v51, %v2776_v54  ;;  %p2431_p8 = pnand %p2430_p7, %p2426_p11 }
 0x10a   : > { %1217 = vst [vmem:[#allocation2 + $0x58] sm:$0xcc] %v1209_v24  ;;  %v3467_v53 = vpop.permute.xlu1 %1439  ;;  %v3469_v18 = vpop.permute.xlu2 %1241  ;;  %v1194_v24 = vunpack.c.l.b16 %v1178_v10  ;;  %vm1740_vm6 = vcmp.ne.s32.totalorder %v3480_v45, %v2779_v55  ;;  %vm1491_vm2 = vmpackc.low %vm3506_vm7, %vm3502_vm10  ;;  %v1762_v42 = vsel %vm3494_vm9, %v1644_v47, 0  ;;  %v3575_v43 = vunpack.c.l.b16 %v1308_v60  ;;  %v3651_v23 = vld [vmem:[#allocation2 + $0x24] sm:$0xf0] }
 0x10b   : > { %4745 = vst [vmem:[#allocation18_spill] sm:$0xff] %v3467_v53  ;;  %vm3571_vm13 = vmpackc.low %vm1342_vm3, %vm1341_vm8  ;;  %vm4762_vm1 = vcmp.ne.s32.totalorder %v3378_v35, %v2779_v55  ;;  %v3591_v6 = vunpack.c.h.b16 %v1308_v60  ;;  %v3593_v57 = vunpack.c.l.b16 %v1309_v61  ;;  %v3595_v47 = vunpack.c.h.b16 %v1309_v61 }
 0x10c   : > { %vm3587_vm11 = vmpackc.low %vm4762_vm1, %vm1140_vm4  ;;  %v1499_v12 = vperm.slane %v3547_v34, 4  ;;  %vm4765_vm9 = vcmask 924672   ;;  %vm1362_vm4 = vcmp.ne.s32.totalorder %v3537_v31, %v2776_v54  ;;  %vm1363_vm3 = vcmp.ne.s32.totalorder %v3539_v9, %v2779_v55 }
 0x10d   : > { %vm4766_vm8 = vmmov %vm4765_vm9  ;;  %v1495_v61 = vsel %vm1491_vm2, 65537, %v4621_v2  ;;  %vm4768_vm1 = vcmask 1039360   ;;  %v3627_v15 = vunpack.c.l.b16 %v1762_v42  ;;  %vm1320_vm10 = vcmp.ne.s32.totalorder %v3575_v43, %v2776_v54 }
 0x10e   : > { %vm1321_vm7 = vcmp.ne.s32.totalorder %v3591_v6, %v2779_v55  ;;  %vm1327_vm2 = vcmp.ne.s32.totalorder %v3593_v57, %v2776_v54  ;;  %v1500_v5 = vperm.slane %v1495_v61, 0  ;;  %v1556_v45 = vunpack.c.h.b16 %v1505_v20 }
 0x10f   : > { %v1699_v31 = vperm.slane %v3203_v29, 4  ;;  %v1095_v29 = vperm.slane %v3009_v36, 5 }
 0x110   : > { %v3687_v51 = vunpack.c.l.b16 %v1500_v5 }
 0x111   : > { %v1244_v16 = vpop.permute.xlu0 %1243 }
 0x112   : > { %v1048_v10 = vpop.permute.xlu1 %1047  ;;  %v1256_v30 = vsel %vm4765_vm9, %v3469_v18, %v1244_v16  ;;  %v1257_v35 = vsel %vm4766_vm8, %v1244_v16, %v3011_v14  ;;  %v3606_v60 = vpop.permute.xlu2 %1249  ;;  %vm4769_vm9 = vmmov %vm4768_vm1  ;;  %vm1328_vm8 = vcmp.ne.s32.totalorder %v3595_v47, %v2779_v55  ;;  %v3782_v47 = vunpack.c.l.b16 %v1699_v31 }
 0x113   : > { %4767 = vst [vmem:[#allocation22_spill] sm:$0xff] %v3606_v60  ;;  %v1061_v16 = vsel %vm4768_vm1, %v3258_v4, %v1048_v10  ;;  %v1062_v28 = vsel %vm4769_vm9, %v1048_v10, %v3200_v50  ;;  %v1374_v14 = vsel %vm3533_vm15, %v1256_v30, 0  ;;  %v1375_v17 = vsel %vm3571_vm13, %v1257_v35, 0  ;;  %vm3659_vm1 = vmpackc.low %vm1733_vm5, %vm1732_vm0 }
 0x114   : > { %v1179_v27 = vsel %vm3519_vm14, %v1061_v16, 0  ;;  %v1180_v25 = vsel %vm3587_vm11, %v1062_v28, 0  ;;  %v1390_v2 = vunpack.c.l.b16 %v1374_v14  ;;  %v1391_v22 = vunpack.c.l.b16 %v1375_v17  ;;  %vm3675_vm9 = vmpackc.low %vm1740_vm6, %vm1739_vm12 }
 0x115   : > { %v1195_v4 = vunpack.c.l.b16 %v1179_v27  ;;  %v1196_v0 = vunpack.c.l.b16 %v1180_v25  ;;  %vm4770_vm14 = vcmp.ne.s32.totalorder %v3360_v26, %v2776_v54  ;;  %vm4771_vm15 = vcmp.ne.s32.totalorder %v3395_v40, %v2779_v55 }
 0x116   : > { %v1397_v50 = vpack.c.b16 %v1391_v22, %v1390_v2  ;;  %vm3641_vm13 = vmpackc.low %vm4771_vm15, %vm4770_vm14  ;;  %vm4774_vm11 = vcmask 916480   ;;  %v3663_v40 = vunpack.c.l.b16 %v1499_v12  ;;  %v1670_v10 = vperm.slane %v3105_v46, 2 }
 0x117   : > { %v1450_v2 = vsel %vm4774_vm11, %v3467_v53, %v3372_v11  ;;  %v1202_v14 = vpack.c.b16 %v1195_v4, %v1194_v24  ;;  %v1203_v17 = vpack.c.b16 %v3486_v59, %v1196_v0  ;;  %v3665_v24 = vunpack.c.h.b16 %v1499_v12  ;;  %vm3715_vm14 = vmpackc.low %vm1363_vm3, %vm1362_vm4 }
 0x118   : > { %1405 = vst [vmem:[#allocation2 + $0x68] sm:$0x33] %v1397_v50  ;;  %v1501_v59 = vperm.slane %v1495_v61, 4  ;;  %v3667_v0 = vunpack.c.l.b16 %v1505_v20  ;;  %v1671_v12 = vperm.slane %v3105_v46, 3  ;;  %v1568_v30 = vsel %vm3641_vm13, %v1450_v2, 0 }
 0x119   : > { %v1206_v42 = vrot.slane %v1202_v14, 6  ;;  %v1207_v41 = vrot.slane %v1203_v17, 6  ;;  %v1238_v52 = vpop.permute.xlu0 %1237  ;;  %vm4779_vm0 = vcmask 908288   ;;  %vm3695_vm12 = vcmp.eq.s32.totalorder %v1670_v10, 1  ;;  %v3739_v10 = vld [vmem:[#allocation2 + $0xc] sm:$0xf] }
 0x11a   : > { %v1632_v35 = vpop.permute.xlu1 %1631  ;;  %v3685_v61 = vpop.permute.xlu2 %1429  ;;  %vm4780_vm5 = vmmov %vm4779_vm0  ;;  %vm3699_vm6 = vcmp.eq.s32.totalorder %v1671_v12, 1  ;;  %v1521_v28 = vunpack.c.h.b16 %v1500_v5  ;;  %v1527_v2 = vunpack.c.l.b16 %v1501_v59  ;;  %v3707_v14 = vunpack.c.l.b16 %v1568_v30 }
 0x11b   : > { %1214 = vst [vmem:[#allocation2 + $0x40] sm:$0xcc] %v1206_v42  ;;  %v1642_v27 = vsel %vm4779_vm0, %v3198_v48, %v1632_v35  ;;  %v1643_v25 = vsel %vm4780_vm5, %v1632_v35, %v3181_v13  ;;  %v1498_v42 = vperm.slane %v3547_v34, 0  ;;  %vm4787_vm15 = vcmask 924672   ;;  %vm1685_vm4 = vmpackc.low %vm3699_vm6, %vm3695_vm12 }
 0x11c   : > { %1215 = vst [vmem:[#allocation2 + $0x48] sm:$0xcc] %v1207_v41  ;;  %v1760_v20 = vsel %vm3659_vm1, %v1642_v27, 0  ;;  %v1761_v50 = vsel %vm3675_vm9, %v1643_v25, 0  ;;  %v3720_v41 = vld [vmem:[#allocation2 + $0x28] sm:$0xf0]  ;;  %v1260_v5 = vsel %vm4787_vm15, %v3606_v60, %v3462_v1  ;;  %v1528_v19 = vunpack.c.h.b16 %v1501_v59  ;;  %vm3747_vm9 = vmpackc.low %vm1321_vm7, %vm1320_vm10 }
 0x11d   : > { %v1776_v17 = vunpack.c.l.b16 %v1760_v20  ;;  %v1777_v26 = vunpack.c.l.b16 %v1761_v50  ;;  %vm1559_vm13 = vcmp.ne.s32.totalorder %v3667_v0, %v2776_v54  ;;  %vm1517_vm3 = vcmp.ne.s32.totalorder %v3663_v40, %v2776_v54  ;;  %vm3765_vm10 = vmpackc.low %vm1328_vm8, %vm1327_vm2 }
 0x11e   : > { %vm1518_vm11 = vcmp.ne.s32.totalorder %v3665_v24, %v2779_v55  ;;  %vm1560_vm1 = vcmp.ne.s32.totalorder %v1556_v45, %v2779_v55  ;;  %v1668_v34 = vperm.slane %v3105_v46, 0  ;;  %v1669_v59 = vperm.slane %v3105_v46, 1 }
 0x11f   : > { %v1782_v9 = vpack.c.b16 %v1777_v26, %v1776_v17  ;;  %vm1524_vm0 = vcmp.ne.s32.totalorder %v3687_v51, %v2776_v54  ;;  %vm1525_vm5 = vcmp.ne.s32.totalorder %v1521_v28, %v2779_v55  ;;  %vm1531_vm15 = vcmp.ne.s32.totalorder %v1527_v2, %v2776_v54  ;;  %vm3809_vm6 = vmpackc.low %vm1560_vm1, %vm1559_vm13 }
 0x120   : > { %v1378_v43 = vsel %vm3715_vm14, %v1260_v5, 0  ;;  %v3769_v30 = vunpack.c.l.b16 %v1498_v42  ;;  %v3771_v35 = vunpack.c.h.b16 %v1498_v42  ;;  %v4792_v27 = vmov 0   ;;  %vm3830_vm13 = vmpackc.low %vm1525_vm5, %vm1524_vm0 }
 0x121   : > { %1790 = vst [vmem:[#allocation2 + $0x90] sm:$0x33] %v1782_v9  ;;  %v1432_v12 = vpop.permute.xlu0 %1431  ;;  %v1689_v25 = vsel %vm1685_vm4, 65537, %v4792_v27  ;;  %vm1532_vm7 = vcmp.ne.s32.totalorder %v1528_v19, %v2779_v55  ;;  %v3784_v50 = vunpack.c.h.b16 %v1699_v31  ;;  %v1315_v13 = vperm.slane %v3431_v8, 4 }
 0x122   : > { %v1240_v57 = vpop.permute.xlu1 %1239  ;;  %v3779_v20 = vpop.permute.xlu2 %465  ;;  %vm4793_vm2 = vcmask 924672   ;;  %vm3790_vm14 = vcmp.eq.s32.totalorder %v1668_v34, 1  ;;  %vm3794_vm12 = vcmp.eq.s32.totalorder %v1669_v59, 1  ;;  %v3798_v42 = vunpack.c.l.b16 %v1378_v43 }
 0x123   : > { %v1254_v17 = vsel %vm4793_vm2, %v1238_v52, %v1240_v57  ;;  %vm4794_vm8 = vmmov %vm4793_vm2  ;;  %v1694_v52 = vperm.slane %v1689_v25, 0  ;;  %vm1510_vm4 = vcmp.ne.s32.totalorder %v3769_v30, %v2776_v54  ;;  %v1695_v34 = vperm.slane %v1689_v25, 4 }
 0x124   : > { %v1255_v4 = vsel %vm4794_vm8, %v1240_v57, %v3469_v18  ;;  %v1372_v5 = vsel %vm3747_vm9, %v1254_v17, 0  ;;  %vm1511_vm9 = vcmp.ne.s32.totalorder %v3771_v35, %v2779_v55  ;;  %v503_v0 = vperm.slane %v2759_v44, 6  ;;  %vm3844_vm8 = vmpackc.low %vm1532_vm7, %vm1531_vm15 }
 0x125   : > { %v1373_v8 = vsel %vm3765_vm10, %v1255_v4, 0  ;;  %v1388_v31 = vunpack.c.l.b16 %v1372_v5  ;;  %vm1684_vm10 = vmpackc.low %vm3794_vm12, %vm3790_vm14  ;;  %v504_v45 = vperm.slane %v2759_v44, 7  ;;  %v1094_v59 = vperm.slane %v3009_v36, 4 }
 0x126   : > { %v1389_v9 = vunpack.c.l.b16 %v1373_v8  ;;  %vm1753_vm1 = vcmp.ne.s32.totalorder %v3782_v47, %v2776_v54  ;;  %v3838_v25 = vunpack.c.l.b16 %v1315_v13  ;;  %v3848_v51 = vunpack.c.h.b16 %v1315_v13  ;;  %vm3882_vm7 = vmpackc.low %vm1518_vm11, %vm1517_vm3 }
 0x127   : > { %v3850_v28 = vunpack.c.l.b16 %v1694_v52  ;;  %vm3852_vm0 = vcmp.eq.s32.totalorder %v503_v0, 1  ;;  %vm3856_vm5 = vcmp.eq.s32.totalorder %v504_v45, 1  ;;  %v3860_v4 = vunpack.c.h.b16 %v1694_v52 }
 0x128   : > { %v1396_v43 = vpack.c.b16 %v1389_v9, %v1388_v31  ;;  %v3862_v19 = vunpack.c.l.b16 %v1695_v34  ;;  %v3864_v5 = vunpack.c.h.b16 %v1695_v34  ;;  %v1688_v13 = vsel %vm1684_vm10, 65537, %v4792_v27  ;;  %vm516_vm15 = vmpackc.low %vm3856_vm5, %vm3852_vm0 }
 0x129   : > { %v1462_v2 = vpop.permute.xlu0 %1461  ;;  %vm4811_vm2 = vcmask 916480   ;;  %vm3892_vm12 = vcmp.eq.s32.totalorder %v1094_v59, 1  ;;  %vm3896_vm10 = vcmp.eq.s32.totalorder %v1095_v29, 1  ;;  %v520_v45 = vsel %vm516_vm15, 65537, %v4792_v27 }
 0x12a   : > { %1404 = vst [vmem:[#allocation2 + $0x60] sm:$0x33] %v1396_v43  ;;  %v1445_v22 = vsel %vm4811_vm2, %v3685_v61, %v1432_v12  ;;  %v1434_v26 = vpop.permute.xlu1 %1433  ;;  %v3888_v52 = vpop.permute.xlu2 %849  ;;  %vm4812_vm14 = vmmov %vm4811_vm2  ;;  %v1693_v43 = vperm.slane %v1688_v13, 4  ;;  %v527_v18 = vperm.slane %v520_v45, 0  ;;  %vm1725_vm5 = vcmp.ne.s32.totalorder %v3862_v19, %v2776_v54 }
 0x12b   : > { %v1466_v31 = vsel %vm4812_vm14, %v3372_v11, %v1462_v2  ;;  %vm4817_vm3 = vmmov %vm4811_vm2  ;;  %v1563_v57 = vsel %vm3882_vm7, %v1445_v22, 0  ;;  %v1692_v2 = vperm.slane %v1688_v13, 0  ;;  %vm1726_vm15 = vcmp.ne.s32.totalorder %v3864_v5, %v2779_v55 }
 0x12c   : > { %v1446_v24 = vsel %vm4817_vm3, %v1432_v12, %v1434_v26  ;;  %vm4818_vm11 = vmmov %vm4811_vm2  ;;  %v1569_v0 = vsel %vm3809_vm6, %v1466_v31, 0  ;;  %vm1369_vm6 = vcmp.ne.s32.totalorder %v3838_v25, %v2776_v54  ;;  %vm1370_vm2 = vcmp.ne.s32.totalorder %v3848_v51, %v2779_v55 }
 0x12d   : > { %v1447_v34 = vsel %vm4818_vm11, %v1434_v26, %v2980_v49  ;;  %v1564_v11 = vsel %vm3830_vm13, %v1446_v24, 0  ;;  %v1585_v29 = vunpack.c.l.b16 %v1569_v0  ;;  %vm1718_vm13 = vcmp.ne.s32.totalorder %v3850_v28, %v2776_v54  ;;  %vm1108_vm0 = vmpackc.low %vm3896_vm10, %vm3892_vm12 }
 0x12e   : > { %v1565_v59 = vsel %vm3844_vm8, %v1447_v34, 0  ;;  %v1580_v12 = vunpack.c.l.b16 %v1564_v11  ;;  %vm1719_vm8 = vcmp.ne.s32.totalorder %v3860_v4, %v2779_v55  ;;  %v1579_v36 = vunpack.c.l.b16 %v1563_v57  ;;  %vm3935_vm7 = vmpackc.low %vm1511_vm9, %vm1510_vm4 }
 0x12f   : > { %v1581_v17 = vunpack.c.l.b16 %v1565_v59  ;;  %v1589_v26 = vpack.c.b16 %v1585_v29, %v3707_v14  ;;  %v528_v14 = vperm.slane %v520_v45, 4  ;;  %v3939_v22 = vunpack.c.l.b16 %v1693_v43  ;;  %vm4824_vm4 = vmmov %vm4817_vm3 }
 0x130   : > { %v3941_v31 = vunpack.c.h.b16 %v1693_v43  ;;  %vm4821_vm14 = vcmp.ne.s32.totalorder %v3784_v50, %v2779_v55  ;;  %v3955_v35 = vunpack.c.l.b16 %v1692_v2  ;;  %v1112_v24 = vsel %vm1108_vm0, 65537, %v4792_v27 }
 0x131   : > { %v1587_v6 = vpack.c.b16 %v1581_v17, %v1580_v12  ;;  %v1593_v13 = vrot.slane %v1589_v26, 6  ;;  %v3943_v40 = vpop.permute.xlu0 %1625  ;;  %vm3951_vm12 = vmpackc.low %vm4821_vm14, %vm1753_vm1  ;;  %v887_v34 = vperm.slane %v2934_v58, 6  ;;  %v3959_v11 = vunpack.c.h.b16 %v1692_v2 }
 0x132   : > { %v1428_v0 = vpop.permute.xlu1 %1427  ;;  %v1656_v45 = vpop.permute.xlu2 %1655  ;;  %v3961_v59 = vunpack.c.l.b16 %v527_v18  ;;  %v3963_v47 = vunpack.c.h.b16 %v527_v18  ;;  %v888_v50 = vperm.slane %v2934_v58, 7  ;;  %vm4825_vm9 = vcmask 908288  }
 0x133   : > { %v1591_v9 = vrot.slane %v1587_v6, 6  ;;  %1601 = vst [vmem:[#allocation2 + $0x78] sm:$0xcc] %v1593_v13  ;;  %v1444_v29 = vsel %vm4824_vm4, %v1428_v0, %v3685_v61  ;;  %v1660_v43 = vsel %vm4825_vm9, %v3370_v38, %v1656_v45  ;;  %v3970_v57 = vunpack.c.l.b16 %v528_v14  ;;  %v3981_v38 = vld [vmem:[#allocation2 + $0x90] sm:$0x33]  ;;  %vm4014_vm9 = vmpackc.low %vm1726_vm15, %vm1725_vm5 }
 0x134   : > { %v501_v12 = vperm.slane %v2759_v44, 4  ;;  %v1562_v17 = vsel %vm3935_vm7, %v1444_v29, 0  ;;  %v1763_v2 = vsel %vm3951_vm12, %v1660_v43, 0  ;;  %v1118_v26 = vperm.slane %v1112_v24, 0  ;;  %vm3999_vm12 = vmpackc.low %vm1719_vm8, %vm1718_vm13 }
 0x135   : > { %1599 = vst [vmem:[#allocation2 + $0x68] sm:$0xcc] %v1591_v9  ;;  %v1119_v18 = vperm.slane %v1112_v24, 4  ;;  %v1578_v6 = vunpack.c.l.b16 %v1562_v17  ;;  %v1779_v13 = vunpack.c.l.b16 %v1763_v2  ;;  %vm1711_vm1 = vcmp.ne.s32.totalorder %v3939_v22, %v2776_v54  ;;  %vm4035_vm5 = vmpackc.low %vm1370_vm2, %vm1369_vm6 }
 0x136   : > { %vm1712_vm10 = vcmp.ne.s32.totalorder %v3941_v31, %v2779_v55  ;;  %vm895_vm3 = vcmp.eq.s32.totalorder %v887_v34, 1  ;;  %vm896_vm11 = vcmp.eq.s32.totalorder %v888_v50, 1  ;;  %vm1704_vm0 = vcmp.ne.s32.totalorder %v3955_v35, %v2776_v54 }
 0x137   : > { %vm1705_vm7 = vcmp.ne.s32.totalorder %v3959_v11, %v2779_v55  ;;  %v3987_v61 = vunpack.c.h.b16 %v528_v14  ;;  %vm900_vm14 = vmpackc.low %vm896_vm11, %vm895_vm3  ;;  %v502_v8 = vperm.slane %v2759_v44, 5  ;;  %v313_v9 = vperm.slane %v2724_v7, 6 }
 0x138   : > { %v314_v30 = vperm.slane %v2724_v7, 7  ;;  %v1586_v24 = vpack.c.b16 %v1579_v36, %v1578_v6  ;;  %v1783_v34 = vpack.c.b16 %v1779_v13, %v3627_v15  ;;  %v904_v14 = vsel %vm900_vm14, 65537, %v4792_v27 }
 0x139   : > { %vm4004_vm4 = vcmp.eq.s32.totalorder %v501_v12, 1  ;;  %v4018_v28 = vunpack.c.l.b16 %v1118_v26  ;;  %vm4020_vm13 = vcmp.eq.s32.totalorder %v502_v8, 1  ;;  %vm4024_vm8 = vcmp.eq.s32.totalorder %v313_v9, 1  ;;  %v1628_v50 = vpop.permute.xlu0 %1627 }
 0x13a   : > { %v1875_v45 = vunpack.c.l.b16 %v3981_v38  ;;  %v1590_v19 = vrot.slane %v1586_v24, 6  ;;  %1791 = vst [vmem:[#allocation2 + $0x98] sm:$0x33] %v1783_v34  ;;  %v4039_v29 = vunpack.c.h.b16 %v1118_v26  ;;  %v4041_v43 = vunpack.c.l.b16 %v1119_v18  ;;  %v1272_v17 = vpop.permute.xlu1 %1271  ;;  %v4051_v2 = vpop.permute.xlu2 %276  ;;  %vm515_vm14 = vmpackc.low %vm4020_vm13, %vm4004_vm4 }
 0x13b   : > { %vm4043_vm15 = vcmp.eq.s32.totalorder %v314_v30, 1  ;;  %vm4840_vm3 = vcmask 908288   ;;  %v4057_v26 = vunpack.c.h.b16 %v1119_v18  ;;  %v911_v6 = vperm.slane %v904_v14, 0  ;;  %vm4120_vm4 = vmpackc.low %vm1712_vm10, %vm1711_vm1 }
 0x13c   : > { %v1640_v25 = vsel %vm4840_vm3, %v3943_v40, %v1628_v50  ;;  %vm4841_vm11 = vmmov %vm4840_vm3  ;;  %1598 = vst [vmem:[#allocation2 + $0x60] sm:$0xcc] %v1590_v19  ;;  %vm4842_vm3 = vcmask 924672   ;;  %v695_v18 = vperm.slane %v2882_v37, 4  ;;  %v912_v24 = vperm.slane %v904_v14, 4 }
 0x13d   : > { %v1641_v51 = vsel %vm4841_vm11, %v1628_v50, %v3198_v48  ;;  %v1276_v48 = vsel %vm4842_vm3, %v3462_v1, %v1272_v17  ;;  %v1758_v13 = vsel %vm3999_vm12, %v1640_v25, 0  ;;  %vm582_vm11 = vcmp.ne.s32.totalorder %v3970_v57, %v2776_v54  ;;  %vm326_vm6 = vmpackc.low %vm4043_vm15, %vm4024_vm8  ;;  %v4089_v19 = vld [vmem:[#allocation2 + $0x64] sm:$0xf0]  ;;  %v4091_v5 = vld [vmem:[#allocation2 + $0x68] sm:$0xf0] }
 0x13e   : > { %v1759_v8 = vsel %vm4014_vm9, %v1641_v51, 0  ;;  %v1379_v1 = vsel %vm4035_vm5, %v1276_v48, 0  ;;  %v1774_v9 = vunpack.c.l.b16 %v1758_v13  ;;  %vm1154_vm12 = vcmp.ne.s32.totalorder %v4018_v28, %v2776_v54  ;;  %v4108_v51 = vld [vmem:[#allocation2 + $0x48] sm:$0xf]  ;;  %v4110_v48 = vld [vmem:[#allocation2 + $0x4c] sm:$0xf]  ;;  %vm4138_vm1 = vmpackc.low %vm1705_vm7, %vm1704_vm0 }
 0x13f   : > { %v1775_v30 = vunpack.c.l.b16 %v1759_v8  ;;  %v1395_v34 = vunpack.c.l.b16 %v1379_v1  ;;  %vm1155_vm9 = vcmp.ne.s32.totalorder %v4039_v29, %v2779_v55  ;;  %v696_v0 = vperm.slane %v2882_v37, 5  ;;  %v4212_v57 = vld [vmem:[#allocation2 + $0x58] sm:$0xf] }
 0x140   : > { %vm1161_vm3 = vcmp.ne.s32.totalorder %v4041_v43, %v2776_v54  ;;  %vm1162_vm2 = vcmp.ne.s32.totalorder %v4057_v26, %v2779_v55  ;;  %v4093_v14 = vunpack.c.l.b16 %v911_v6  ;;  %v519_v50 = vsel %vm515_vm14, 65537, %v4792_v27 }
 0x141   : > { %v1781_v15 = vpack.c.b16 %v1775_v30, %v1774_v9  ;;  %v330_v17 = vsel %vm326_vm6, 65537, %v4792_v27  ;;  %v1399_v25 = vpack.c.b16 %v1395_v34, %v3798_v42  ;;  %vm1923_vm5 = vcmask 1041408   ;;  %v1812_v8 = vld [vmem:[#allocation2 + $0x98] sm:$0x33]  ;;  %v1622_v31 = vpop.permute.xlu0 %1621 }
 0x142   : > { %v4112_v13 = vunpack.c.h.b16 %v911_v6  ;;  %v525_v4 = vperm.slane %v519_v50, 0  ;;  %v526_v44 = vperm.slane %v519_v50, 4  ;;  %v4124_v42 = vunpack.c.l.b16 %v912_v24  ;;  %v1624_v34 = vpop.permute.xlu1 %1623  ;;  %v4150_v35 = vpop.permute.xlu2 %659 }
 0x143   : > { %1789 = vst [vmem:[#allocation2 + $0x88] sm:$0x33] %v1781_v15  ;;  %v4126_v12 = vunpack.c.h.b16 %v912_v24  ;;  %v337_v6 = vperm.slane %v330_v17, 0  ;;  %vm4128_vm13 = vcmp.eq.s32.totalorder %v695_v18, 1  ;;  %v1877_v50 = vunpack.c.l.b16 %v1812_v8 }
 0x144   : > { %1407 = vst [vmem:[#allocation2 + $0x78] sm:$0x33] %v1399_v25  ;;  %v4146_v30 = vunpack.c.l.b16 %v525_v4  ;;  %v4148_v24 = vunpack.c.h.b16 %v525_v4  ;;  %v4152_v15 = vunpack.c.l.b16 %v526_v44  ;;  %v4154_v11 = vunpack.c.h.b16 %v526_v44 }
 0x145   : > { %v1878_v25 = vunpack.c.h.b16 %v1812_v8  ;;  %vm4849_vm10 = vcmask 908288   ;;  %vm959_vm7 = vcmp.ne.s32.totalorder %v4093_v14, %v2776_v54  ;;  %vm960_vm8 = vcmp.ne.s32.totalorder %v4112_v13, %v2779_v55 }
 0x146   : > { %v1639_v46 = vsel %vm4849_vm10, %v1624_v34, %v3943_v40  ;;  %vm4850_vm0 = vmmov %vm4849_vm10  ;;  %v338_v4 = vperm.slane %v330_v17, 4  ;;  %v4166_v18 = vpack.c.b16 %v1875_v45, %v1875_v45  ;;  %v4176_v8 = vunpack.c.l.b16 %v337_v6 }
 0x147   : > { %v1638_v16 = vsel %vm4850_vm0, %v1622_v31, %v1624_v34  ;;  %v1757_v44 = vsel %vm4120_vm4, %v1639_v46, 0  ;;  %v4178_v17 = vunpack.c.h.b16 %v337_v6  ;;  %vm4851_vm14 = vcmp.ne.s32.totalorder %v3961_v59, %v2776_v54  ;;  %v4208_v59 = vld [vmem:[#allocation2 + $0x5c] sm:$0xf0] }
 0x148   : > { %v1756_v40 = vsel %vm4138_vm1, %v1638_v16, 0  ;;  %v1773_v31 = vunpack.c.l.b16 %v1757_v44  ;;  %vm4852_vm4 = vcmp.ne.s32.totalorder %v3963_v47, %v2779_v55  ;;  %v1901_v46 = vpack.c.b16 %v1877_v50, %v1877_v50  ;;  %v4210_v47 = vld [vmem:[#allocation2 + $0x60] sm:$0xf0]  ;;  %v4230_v44 = vld [vmem:[#allocation2 + $0x40] sm:$0xf] }
 0x149   : > { %v1772_v34 = vunpack.c.l.b16 %v1756_v40  ;;  %vm4186_vm10 = vmpackc.low %vm4852_vm4, %vm4851_vm14  ;;  %v1902_v45 = vpack.c.b16 %v1878_v25, %v1878_v25  ;;  %vm4855_vm1 = vcmp.ne.s32.totalorder %v3987_v61, %v2779_v55  ;;  %vm561_vm6 = vcmp.ne.s32.totalorder %v4146_v30, %v2776_v54  ;;  %v468_v9 = vpop.permute.xlu0 %467 }
 0x14a   : > { %vm4196_vm0 = vmpackc.low %vm4855_vm1, %vm582_vm11  ;;  %vm562_vm14 = vcmp.ne.s32.totalorder %v4148_v24, %v2779_v55  ;;  %vm568_vm4 = vcmp.ne.s32.totalorder %v4152_v15, %v2776_v54  ;;  %v1810_v22 = vld [vmem:[#allocation2 + $0x88] sm:$0x33]  ;;  %v4224_v50 = vunpack.c.l.b16 %v338_v4  ;;  %v4226_v25 = vunpack.c.h.b16 %v338_v4  ;;  %v1054_v26 = vpop.permute.xlu2 %1053 }
 0x14b   : > { %v1780_v61 = vpack.c.b16 %v1773_v31, %v1772_v34  ;;  %vm4220_vm11 = vmpackc.low %vm1155_vm9, %vm1154_vm12  ;;  %vm704_vm1 = vcmp.eq.s32.totalorder %v696_v0, 1  ;;  %v1873_v40 = vunpack.c.l.b16 %v1810_v22  ;;  %v1874_v31 = vunpack.c.h.b16 %v1810_v22  ;;  %v4240_v34 = vld [vmem:[#allocation2 + $0x44] sm:$0xf]  ;;  %v4242_v4 = vld [vmem:[#allocation2 + $0x74] sm:$0xf0]  ;;  %v470_v22 = vpop.permute.xlu1 %469 }
 0x14c   : > { %v4233_v28 = vsel %vm1923_vm5, %v1901_v46, 0  ;;  %v4236_v29 = vsel %vm1923_vm5, %v1902_v45, 0  ;;  %vm709_vm12 = vmpackc.low %vm704_vm1, %vm4128_vm13  ;;  %vm4862_vm13 = vcmask 130048   ;;  %vm392_vm15 = vcmp.ne.s32.totalorder %v4224_v50, %v2776_v54  ;;  %v4298_v0 = vld [vmem:[#allocation2 + $0x5c] sm:$0xf] }
 0x14d   : > { %1788 = vst [vmem:[#allocation2 + $0x80] sm:$0x33] %v1780_v61  ;;  %vm4250_vm9 = vmpackc.low %vm1162_vm2, %vm1161_vm3  ;;  %v713_v46 = vsel %vm709_vm12, 65537, %v4792_v27  ;;  %v477_v43 = vsel %vm4862_vm13, %v3779_v20, %v468_v9  ;;  %v1897_v60 = vpack.c.b16 %v1873_v40, %v1873_v40  ;;  %v1898_v53 = vpack.c.b16 %v1874_v31, %v1874_v31 }
 0x14e   : > { %vm386_vm3 = vcmp.ne.s32.totalorder %v4178_v17, %v2779_v55  ;;  %v719_v1 = vperm.slane %v713_v46, 0  ;;  %vm4863_vm1 = vmmov %vm4862_vm13  ;;  %v591_v45 = vsel %vm4186_vm10, %v477_v43, 0  ;;  %vm4864_vm12 = vcmask 1039360  }
 0x14f   : > { %v478_v49 = vsel %vm4863_vm1, %v468_v9, %v470_v22  ;;  %v1064_v61 = vsel %vm4864_vm12, %v2858_v62, %v1054_v26  ;;  %vm4865_vm13 = vmmov %vm4864_vm12  ;;  %vm393_vm2 = vcmp.ne.s32.totalorder %v4226_v25, %v2779_v55  ;;  %v607_v31 = vunpack.c.l.b16 %v591_v45  ;;  %v4284_v62 = vld [vmem:[#allocation2 + $0x78] sm:$0xf0] }
 0x150   : > { %v1065_v58 = vsel %vm4865_vm13, %v1054_v26, %v2978_v39  ;;  %v592_v40 = vsel %vm4196_vm0, %v478_v49, 0  ;;  %v1182_v9 = vsel %vm4220_vm11, %v1064_v61, 0  ;;  %v1931_v26 = vsel %vm1923_vm5, %v1897_v60, 0  ;;  %vm4294_vm10 = vmpackc.low %vm960_vm8, %vm959_vm7 }
 0x151   : > { %v1183_v16 = vsel %vm4250_vm9, %v1065_v58, 0  ;;  %v608_v22 = vunpack.c.l.b16 %v592_v40  ;;  %v1198_v39 = vunpack.c.l.b16 %v1182_v9  ;;  %1979 = vmatpush.bf16.msra.mxu2 %v1931_v26  ;;  %v1934_v7 = vsel %vm1923_vm5, %v1898_v53, 0  ;;  %vm4322_vm7 = vmpackc.low %vm562_vm14, %vm561_vm6  ;;  %v852_v61 = vpop.permute.xlu0 %851 }
 0x152   : > { %v1199_v43 = vunpack.c.l.b16 %v1183_v16  ;;  %v720_v58 = vperm.slane %v713_v46, 4  ;;  %v751_v36 = vunpack.c.l.b16 %v719_v1  ;;  %v752_v6 = vunpack.c.h.b16 %v719_v1  ;;  %1992 = vmatpush.bf16.msra.mxu3 %v1934_v7 }
 0x153   : > { %v612_v45 = vpack.c.b16 %v608_v22, %v607_v31  ;;  %vm4868_vm0 = vcmp.ne.s32.totalorder %v4124_v42, %v2776_v54  ;;  %vm4869_vm11 = vcmp.ne.s32.totalorder %v4126_v12, %v2779_v55  ;;  %v2239_v14 = vor.u32 %v4298_v0, %v4284_v62  ;;  %v854_v9 = vpop.permute.xlu1 %853  ;;  %v464_v22 = vpop.permute.xlu2 %463 }
 0x154   : > { %v1204_v60 = vpack.c.b16 %v1199_v43, %v1198_v39  ;;  %vm4306_vm9 = vmpackc.low %vm4869_vm11, %vm4868_vm0  ;;  %v4314_v13 = vsel %vm1923_vm5, %v4166_v18, 0  ;;  %v1809_v42 = vld [vmem:[#allocation2 + $0x80] sm:$0x33]  ;;  %vm755_vm8 = vcmp.ne.s32.totalorder %v751_v36, %v2776_v54  ;;  %vm756_vm1 = vcmp.ne.s32.totalorder %v752_v6, %v2779_v55 }
 0x155   : > { %v758_v12 = vunpack.c.l.b16 %v720_v58  ;;  %v759_v46 = vunpack.c.h.b16 %v720_v58  ;;  %v616_v1 = vrot.slane %v612_v45, 6  ;;  %vm4874_vm12 = vcmp.ne.s32.totalorder %v4154_v11, %v2779_v55 }
 0x156   : > { %v1208_v18 = vrot.slane %v1204_v60, 6  ;;  %vm4334_vm6 = vmpackc.low %vm4874_vm12, %vm568_vm4  ;;  %v1871_v24 = vunpack.c.l.b16 %v1809_v42  ;;  %v1872_v40 = vunpack.c.h.b16 %v1809_v42  ;;  %v4877_v31 = vor.u32 %v4089_v19, %v4108_v51 }
 0x157   : > { %vm4878_vm14 = vcmask 7168   ;;  %vm762_vm13 = vcmp.ne.s32.totalorder %v758_v12, %v2776_v54  ;;  %vm763_vm0 = vcmp.ne.s32.totalorder %v759_v46, %v2779_v55  ;;  %v1876_v15 = vunpack.c.h.b16 %v3981_v38  ;;  %624 = vst [vmem:[#allocation2 + $0x18] sm:$0xcc] %v616_v1 }
 0x158   : > { %1980 = vmatpush.bf16.msra.mxu2 %v4877_v31  ;;  %v861_v16 = vsel %vm4878_vm14, %v3888_v52, %v852_v61  ;;  %v4879_v11 = vor.u32 %v4110_v48, %v4091_v5  ;;  %vm4880_vm4 = vmmov %vm4878_vm14  ;;  %vm4881_vm11 = vcmask 130048   ;;  %1216 = vst [vmem:[#allocation2 + $0x50] sm:$0xcc] %v1208_v18  ;;  %v1895_v60 = vpack.c.b16 %v1871_v24, %v1871_v24 }
 0x159   : > { %v862_v39 = vsel %vm4880_vm4, %v852_v61, %v854_v9  ;;  %v975_v19 = vsel %vm4294_vm10, %v861_v16, 0  ;;  %v475_v51 = vsel %vm4881_vm11, %v2900_v56, %v464_v22  ;;  %vm4882_vm12 = vmmov %vm4881_vm11  ;;  %vm4883_vm10 = vcmp.ne.s32.totalorder %v4176_v8, %v2776_v54  ;;  %v279_v6 = vpop.permute.xlu0 %278  ;;  %v4910_v56 = vld [vmem:[#allocation19_spill] sm:$0xff] }
 0x15a   : > { %1993 = vmatpush.bf16.msra.mxu3 %v4879_v11  ;;  %v476_v43 = vsel %vm4882_vm12, %v464_v22, %v3779_v20  ;;  %v976_v38 = vsel %vm4306_vm9, %v862_v39, 0  ;;  %v991_v26 = vunpack.c.l.b16 %v975_v19  ;;  %v589_v5 = vsel %vm4322_vm7, %v475_v51, 0  ;;  %vm4368_vm14 = vmpackc.low %vm386_vm3, %vm4883_vm10 }
 0x15b   : > { %v590_v48 = vsel %vm4334_vm6, %v476_v43, 0  ;;  %v992_v58 = vunpack.c.l.b16 %v976_v38  ;;  %v605_v49 = vunpack.c.l.b16 %v589_v5  ;;  %v1896_v20 = vpack.c.b16 %v1872_v40, %v1872_v40  ;;  %vm4381_vm9 = vmpackc.low %vm393_vm2, %vm392_vm15  ;;  %v281_v12 = vpop.permute.xlu1 %280  ;;  %v658_v30 = vpop.permute.xlu2 %657 }
 0x15c   : > { %v606_v45 = vunpack.c.l.b16 %v590_v48  ;;  %v4886_v53 = vor.u32 %v3651_v23, %v3681_v3  ;;  %v1900_v17 = vpack.c.b16 %v1876_v15, %v1876_v15  ;;  %v697_v7 = vperm.slane %v2882_v37, 6  ;;  %vm4396_vm15 = vmpackc.low %vm756_vm1, %vm755_vm8 }
 0x15d   : > { %v698_v42 = vperm.slane %v2882_v37, 7  ;;  %v996_v1 = vpack.c.b16 %v992_v58, %v991_v26  ;;  %v1925_v23 = vsel %vm1923_vm5, %v1895_v60, 0  ;;  %v4889_v3 = vor.u32 %v3739_v10, %v3720_v41  ;;  %vm4407_vm2 = vmpackc.low %vm763_vm0, %vm762_vm13  ;;  %v4909_v60 = vld [vmem:[#allocation21_spill] sm:$0xff] }
 0x15e   : > { %1981 = vmatpush.bf16.msra.mxu2 %v4886_v53  ;;  %v611_v18 = vpack.c.b16 %v606_v45, %v605_v49  ;;  %v1288_v37 = vperm.slane %v3206_v63, 4  ;;  %1953 = vmatpush.bf16.msra.mxu0 %v1925_v23  ;;  %v1928_v25 = vsel %vm1923_vm5, %v1896_v20, 0  ;;  %v1940_v10 = vsel %vm1923_vm5, %v1900_v17, 0  ;;  %v4468_v45 = vld [vmem:[%s4607_s0] sm:$0xf] }
 0x15f   : > { %1994 = vmatpush.bf16.msra.mxu3 %v4889_v3  ;;  %vm705_vm3 = vcmp.eq.s32.totalorder %v697_v7, 1  ;;  %vm706_vm7 = vcmp.eq.s32.totalorder %v698_v42, 1  ;;  %1966 = vmatpush.bf16.msra.mxu1 %v1928_v25  ;;  %v1289_v61 = vperm.slane %v3206_v63, 5  ;;  %vm4896_vm6 = vcmask 138240   ;;  %v1813_v42 = vld [vmem:[%s4609_s2] sm:$0xff] }
 0x160   : > { %v615_v36 = vrot.slane %v611_v18, 6  ;;  %vm710_vm8 = vmpackc.low %vm706_vm7, %vm705_vm3  ;;  %vm4413_vm1 = vcmp.eq.s32.totalorder %v1288_v37, 1  ;;  %v288_v46 = vsel %vm4896_vm6, %v4051_v2, %v279_v6  ;;  %v1478_v40 = vperm.slane %v3169_v33, 4  ;;  %1816 = vperm.xlu0 %2346, %v1813_v42  }
 0x161   : > { %v714_v24 = vsel %vm710_vm8, 65537, %v4792_v27  ;;  %v1479_v31 = vperm.slane %v3169_v33, 5  ;;  %vm4897_vm5 = vmmov %vm4896_vm6  ;;  %v401_v63 = vsel %vm4368_vm14, %v288_v46, 0  ;;  %vm4898_vm13 = vcmask 121856   ;;  %v662_v20 = vpop.permute.xlu0 %661 }
 0x162   : > { %2031 = vmatpush.bf16.msrb.mxu2 %v4233_v28  ;;  %v1000_v28 = vrot.slane %v996_v1, 6  ;;  %v289_v9 = vsel %vm4897_vm5, %v279_v6, %v281_v12  ;;  %v669_v16 = vsel %vm4898_vm13, %v3083_v21, %v658_v30  ;;  %vm4899_vm0 = vmmov %vm4898_vm13  ;;  %v4900_v15 = vor.u32 %v4242_v4, %v4212_v57  ;;  %623 = vst [vmem:[#allocation2 + $0x10] sm:$0xcc] %v615_v36  ;;  %v4914_v36 = vld [vmem:[#allocation12_spill] sm:$0xff] }
 0x163   : > { %2044 = vmatpush.bf16.msrb.mxu3 %v4236_v29  ;;  %v670_v22 = vsel %vm4899_vm0, %v658_v30, %v4150_v35  ;;  %v402_v33 = vsel %vm4381_vm9, %v289_v9, 0  ;;  %v417_v11 = vunpack.c.l.b16 %v401_v63  ;;  %v783_v39 = vsel %vm4396_vm15, %v669_v16, 0  ;;  %v664_v17 = vpop.permute.xlu1 %663  ;;  %vm4913_vm5 = vmmov %vm4899_vm0  ;;  %v4919_v9 = vld [vmem:[#allocation14_spill] sm:$0xff] }
 0x164   : > { %1008 = vst [vmem:[#allocation2 + $0x38] sm:$0xcc] %v1000_v28  ;;  %v784_v19 = vsel %vm4407_vm2, %v670_v22, 0  ;;  %v4901_v21 = vor.u32 %v4208_v59, %v4230_v44  ;;  %v418_v57 = vunpack.c.l.b16 %v402_v33  ;;  %v799_v4 = vunpack.c.l.b16 %v783_v39  ;;  %v4924_v39 = vld [vmem:[#allocation15_spill] sm:$0xff] }
 0x165   : > { %v800_v51 = vunpack.c.l.b16 %v784_v19  ;;  %v4902_v43 = vor.u32 %v4240_v34, %v4210_v47  ;;  %v721_v38 = vperm.slane %v714_v24, 0  ;;  %v722_v26 = vperm.slane %v714_v24, 4  ;;  %v4907_v47 = vld [vmem:[#allocation20_spill] sm:$0xff] }
 0x166   : > { %2032 = vmatpush.bf16.msrb.mxu2 %v4900_v15  ;;  %1954 = vmatpush.bf16.msra.mxu0 %v4901_v21  ;;  %vm1297_vm4 = vcmp.eq.s32.totalorder %v1289_v61, 1  ;;  %vm4447_vm11 = vcmp.eq.s32.totalorder %v1478_v40, 1  ;;  %vm4451_vm12 = vcmp.eq.s32.totalorder %v1479_v31, 1  ;;  %v422_v44 = vpack.c.b16 %v418_v57, %v417_v11  ;;  %v4926_v21 = vld [vmem:[#allocation18_spill] sm:$0xff] }
 0x167   : > { %2045 = vmatpush.bf16.msrb.mxu3 %v2239_v14  ;;  %1967 = vmatpush.bf16.msra.mxu1 %v4902_v43  ;;  %v805_v62 = vpack.c.b16 %v800_v51, %v799_v4  ;;  %v765_v0 = vunpack.c.l.b16 %v721_v38  ;;  %v766_v14 = vunpack.c.h.b16 %v721_v38  ;;  %vm1302_vm10 = vmpackc.low %vm1297_vm4, %vm4413_vm1  ;;  %v4908_v34 = vor.u32 %v3525_v32, %v4907_v47  ;;  %v4928_v4 = vld [vmem:[#allocation16_spill] sm:$0xff]  ;;  %v4930_v43 = vld [vmem:[#allocation22_spill] sm:$0xff] }
 0x168   : > { %v772_v48 = vunpack.c.l.b16 %v722_v26  ;;  %v773_v58 = vunpack.c.h.b16 %v722_v26  ;;  %v1306_v49 = vsel %vm1302_vm10, 65537, %v4792_v27  ;;  %vm1492_vm14 = vmpackc.low %vm4451_vm12, %vm4447_vm11  ;;  %vm1919_vm9 = vcmask 293888   ;;  %430 = vst [vmem:[#allocation2 + $0x18] sm:$0x33] %v422_v44 }
 0x169   : > { %v4911_v32 = vor.u32 %v4909_v60, %v4910_v56  ;;  %vm769_vm15 = vcmp.ne.s32.totalorder %v765_v0, %v2776_v54  ;;  %vm770_vm2 = vcmp.ne.s32.totalorder %v766_v14, %v2779_v55  ;;  %v1312_v53 = vperm.slane %v1306_v49, 0  ;;  %813 = vst [vmem:[#allocation2 + $0x30] sm:$0x33] %v805_v62  ;;  %vm4912_vm1 = vmmov %vm4899_vm0  ;;  %2242 = vmatmul.msk.bf16.vlgmr.msra.gmra.mxu2 %vm1919_vm9, %v4468_v45  ;;  %v1438_v22 = vpop.permute.xlu0 %1437 }
 0x16a   : > { %1955 = vmatpush.bf16.msra.mxu0 %v4908_v34  ;;  %v1313_v8 = vperm.slane %v1306_v49, 4  ;;  %vm771_vm3 = vmpackc.low %vm770_vm2, %vm769_vm15  ;;  %vm776_vm7 = vcmp.ne.s32.totalorder %v772_v48, %v2776_v54  ;;  %vm777_vm8 = vcmp.ne.s32.totalorder %v773_v58, %v2779_v55  ;;  %v671_v7 = vsel %vm4912_vm1, %v4150_v35, %v662_v20  ;;  %2243 = vmatmul.msk.bf16.vlgmr.msra.gmra.mxu3 %vm1919_vm9, %v4468_v45 }
 0x16b   : > { %1968 = vmatpush.bf16.msra.mxu1 %v4911_v32  ;;  %vm778_vm6 = vmpackc.low %vm777_vm8, %vm776_vm7  ;;  %v672_v1 = vsel %vm4913_vm5, %v662_v20, %v664_v17  ;;  %v785_v18 = vsel %vm771_vm3, %v671_v7, 0  ;;  %v1344_v23 = vunpack.c.l.b16 %v1312_v53  ;;  %v1345_v3 = vunpack.c.h.b16 %v1312_v53  ;;  %v1248_v11 = vpop.permute.xlu1 %1247 }
 0x16c   : > { %v786_v35 = vsel %vm778_vm6, %v672_v1, 0  ;;  %v801_v50 = vunpack.c.l.b16 %v785_v18  ;;  %v1351_v37 = vunpack.c.l.b16 %v1313_v8  ;;  %v1352_v25 = vunpack.c.h.b16 %v1313_v8 }
 0x16d   : > { %2240 = vmatmul.msk.bf16.vlgmr.msra.gmra.mxu0 %vm1919_vm9, %v4468_v45  ;;  %v802_v41 = vunpack.c.l.b16 %v786_v35  ;;  %vm1348_vm13 = vcmp.ne.s32.totalorder %v1344_v23, %v2776_v54  ;;  %vm1349_vm0 = vcmp.ne.s32.totalorder %v1345_v3, %v2779_v55  ;;  %v311_v6 = vperm.slane %v4914_v36, 4 }
 0x16e   : > { %2005 = vmatpush.bf16.msrb.mxu0 %v4314_v13  ;;  %v1496_v13 = vsel %vm1492_vm14, 65537, %v4792_v27  ;;  %2241 = vmatmul.msk.bf16.vlgmr.msra.gmra.mxu1 %vm1919_vm9, %v4468_v45  ;;  %vm1355_vm4 = vcmp.ne.s32.totalorder %v1351_v37, %v2776_v54  ;;  %vm1356_vm11 = vcmp.ne.s32.totalorder %v1352_v25, %v2779_v55  ;;  %v312_v46 = vperm.slane %v4914_v36, 5  ;;  %vm4504_vm12 = vmpackc.low %vm1349_vm0, %vm1348_vm13 }
 0x16f   : > { %2018 = vmatpush.bf16.msrb.mxu1 %v1940_v10  ;;  %v1502_v10 = vperm.slane %v1496_v13, 0  ;;  %v1503_v28 = vperm.slane %v1496_v13, 4  ;;  %v806_v61 = vpack.c.b16 %v802_v41, %v801_v50  ;;  %vm4508_vm10 = vcmp.eq.s32.totalorder %v311_v6, 1  ;;  %vm4513_vm14 = vmpackc.low %vm1356_vm11, %vm1355_vm4  ;;  %v2202_v32 = vld [vmem:[#allocation2 + $0x18] sm:$0xf]  ;;  %v4934_v50 = vld [vmem:[#allocation13_spill] sm:$0xff] }
 0x170   : > { %v885_v63 = vperm.slane %v4919_v9, 4  ;;  %vm4519_vm3 = vcmp.eq.s32.totalorder %v312_v46, 1  ;;  %v886_v33 = vperm.slane %v4919_v9, 5  ;;  %vm4925_vm6 = vcmask 916480   ;;  %v2261_v13 = vld [vmem:[#allocation2 + $0x1c] sm:$0xf] }
 0x171   : > { %v1534_v29 = vunpack.c.l.b16 %v1502_v10  ;;  %v1535_v12 = vunpack.c.h.b16 %v1502_v10  ;;  %v1541_v24 = vunpack.c.l.b16 %v1503_v28  ;;  %v1542_v40 = vunpack.c.h.b16 %v1503_v28  ;;  %814 = vst [vmem:[#allocation2 + $0x38] sm:$0x33] %v806_v61  ;;  %vm4927_vm5 = vmmov %vm4925_vm6  ;;  %v848_v10 = vpop.permute.xlu0 %847 }
 0x172   : > { %v1448_v19 = vsel %vm4925_vm6, %v4924_v39, %v1438_v22  ;;  %v1449_v57 = vsel %vm4927_vm5, %v1438_v22, %v4926_v21  ;;  %vm4929_vm13 = vcmask 924672   ;;  %vm4534_vm11 = vcmp.eq.s32.totalorder %v885_v63, 1  ;;  %v2226_v63 = vld [vmem:[#allocation2 + $0x50] sm:$0xf]  ;;  %v2268_v39 = vld [vmem:[#allocation2 + $0x54] sm:$0xf] }
 0x173   : > { %vm1538_vm15 = vcmp.ne.s32.totalorder %v1534_v29, %v2776_v54  ;;  %vm1539_vm2 = vcmp.ne.s32.totalorder %v1535_v12, %v2779_v55  ;;  %vm1545_vm8 = vcmp.ne.s32.totalorder %v1541_v24, %v2776_v54  ;;  %vm1546_vm1 = vcmp.ne.s32.totalorder %v1542_v40, %v2779_v55  ;;  %vm4931_vm0 = vmmov %vm4929_vm13  ;;  %v275_v35 = vpop.permute.xlu1 %274  ;;  %v4937_v24 = vld [vmem:[#allocation17_spill] sm:$0xff] }
 0x174   : > { %vm1540_vm7 = vmpackc.low %vm1539_vm2, %vm1538_vm15  ;;  %v1258_v51 = vsel %vm4929_vm13, %v4928_v4, %v1248_v11  ;;  %v1259_v38 = vsel %vm4931_vm0, %v1248_v11, %v4930_v43  ;;  %vm894_vm2 = vcmp.eq.s32.totalorder %v886_v33, 1  ;;  %vm4938_vm13 = vcmask 7168  }
 0x175   : > { %vm1547_vm4 = vmpackc.low %vm1546_vm1, %vm1545_vm8  ;;  %v1566_v26 = vsel %vm1540_vm7, %v1448_v19, 0  ;;  %v1376_v59 = vsel %vm4504_vm12, %v1258_v51, 0  ;;  %v1377_v44 = vsel %vm4513_vm14, %v1259_v38, 0  ;;  %vm4935_vm1 = vcmask 138240  }
 0x176   : > { %v1567_v62 = vsel %vm1547_vm4, %v1449_v57, 0  ;;  %v1582_v0 = vunpack.c.l.b16 %v1566_v26  ;;  %vm325_vm15 = vmpackc.low %vm4519_vm3, %vm4508_vm10  ;;  %v1392_v14 = vunpack.c.l.b16 %v1376_v59  ;;  %v1393_v47 = vunpack.c.l.b16 %v1377_v44 }
 0x177   : > { %v1583_v34 = vunpack.c.l.b16 %v1567_v62  ;;  %v329_v48 = vsel %vm325_vm15, 65537, %v4792_v27  ;;  %vm899_vm12 = vmpackc.low %vm894_vm2, %vm4534_vm11  ;;  %v286_v37 = vsel %vm4935_vm1, %v4934_v50, %v275_v35  ;;  %v859_v40 = vsel %vm4938_vm13, %v4937_v24, %v848_v10 }
 0x178   : > { %v335_v58 = vperm.slane %v329_v48, 0  ;;  %v336_v49 = vperm.slane %v329_v48, 4  ;;  %v1398_v60 = vpack.c.b16 %v1393_v47, %v1392_v14  ;;  %v2265_v7 = vld [vmem:[#allocation2 + $0x34] sm:$0xf0]  ;;  %v2204_v42 = vld [vmem:[#allocation2 + $0x38] sm:$0xf0]  ;;  %vm4936_vm6 = vmmov %vm4935_vm1 }
 0x179   : > { %v1588_v56 = vpack.c.b16 %v1583_v34, %v1582_v0  ;;  %v903_v18 = vsel %vm899_vm12, 65537, %v4792_v27  ;;  %v2203_v23 = vor.u32 %v2265_v7, %v2202_v32  ;;  %v2207_v3 = vor.u32 %v2261_v13, %v2204_v42  ;;  %vm4939_vm11 = vmmov %vm4938_vm13 }
 0x17a   : > { %v367_v20 = vunpack.c.l.b16 %v335_v58  ;;  %v368_v53 = vunpack.c.h.b16 %v335_v58  ;;  %v374_v8 = vunpack.c.l.b16 %v336_v49  ;;  %v375_v17 = vunpack.c.h.b16 %v336_v49  ;;  %1406 = vst [vmem:[#allocation2 + $0x70] sm:$0x33] %v1398_v60 }
 0x17b   : > { %v1592_v1 = vrot.slane %v1588_v56, 6  ;;  %v287_v25 = vsel %vm4936_vm6, %v275_v35, %v4051_v2  ;;  %v909_v27 = vperm.slane %v903_v18, 0  ;;  %v910_v41 = vperm.slane %v903_v18, 4  ;;  %2033 = vmatpush.bf16.msrb.mxu2 %v2203_v23  ;;  %2046 = vmatpush.bf16.msrb.mxu3 %v2207_v3 }
 0x17c   : > { %vm371_vm10 = vcmp.ne.s32.totalorder %v367_v20, %v2776_v54  ;;  %vm372_vm14 = vcmp.ne.s32.totalorder %v368_v53, %v2779_v55  ;;  %vm378_vm3 = vcmp.ne.s32.totalorder %v374_v8, %v2776_v54  ;;  %vm379_vm7 = vcmp.ne.s32.totalorder %v375_v17, %v2779_v55 }
 0x17d   : > { %1600 = vst [vmem:[#allocation2 + $0x70] sm:$0xcc] %v1592_v1  ;;  %vm373_vm8 = vmpackc.low %vm372_vm14, %vm371_vm10  ;;  %v941_v61 = vunpack.c.l.b16 %v909_v27  ;;  %v942_v29 = vunpack.c.h.b16 %v909_v27  ;;  %v948_v46 = vunpack.c.l.b16 %v910_v41  ;;  %v949_v30 = vunpack.c.h.b16 %v910_v41 }
 0x17e   : > { %vm380_vm5 = vmpackc.low %vm379_vm7, %vm378_vm3  ;;  %v399_v28 = vsel %vm373_vm8, %v286_v37, 0  ;;  %2246 = vmatmul.msk.bf16.vlgmr.msrb.gmra.mxu2 %vm1919_vm9, %v4468_v45  ;;  %2247 = vmatmul.msk.bf16.vlgmr.msrb.gmra.mxu3 %vm1919_vm9, %v4468_v45  ;;  %v860_v2 = vsel %vm4939_vm11, %v848_v10, %v3888_v52 }
 0x17f   : > { %v400_v36 = vsel %vm380_vm5, %v287_v25, 0  ;;  %v415_v6 = vunpack.c.l.b16 %v399_v28  ;;  %vm945_vm0 = vcmp.ne.s32.totalorder %v941_v61, %v2776_v54  ;;  %vm946_vm4 = vcmp.ne.s32.totalorder %v942_v29, %v2779_v55 }
 0x180   : > { %v416_v12 = vunpack.c.l.b16 %v400_v36  ;;  %vm947_vm15 = vmpackc.low %vm946_vm4, %vm945_vm0  ;;  %vm952_vm2 = vcmp.ne.s32.totalorder %v948_v46, %v2776_v54  ;;  %vm953_vm12 = vcmp.ne.s32.totalorder %v949_v30, %v2779_v55 }
 0x181   : > { %vm954_vm10 = vmpackc.low %vm953_vm12, %vm952_vm2  ;;  %v973_v9 = vsel %vm947_vm15, %v859_v40, 0 }
 0x182   : > { %v421_v31 = vpack.c.b16 %v416_v12, %v415_v6  ;;  %v974_v16 = vsel %vm954_vm10, %v860_v2, 0  ;;  %v989_v22 = vunpack.c.l.b16 %v973_v9 }
 0x183   : > { %v990_v33 = vunpack.c.l.b16 %v974_v16 }
 0x184   : > { %429 = vst [vmem:[#allocation2 + $0x10] sm:$0x33] %v421_v31  ;;  %v2272_v15 = vld [vmem:[#allocation2 + $0x6c] sm:$0xf0]  ;;  %v2228_v19 = vld [vmem:[#allocation2 + $0x70] sm:$0xf0] }
 0x185   : > { %v2227_v11 = vor.u32 %v2272_v15, %v2226_v63  ;;  %v2231_v21 = vor.u32 %v2268_v39, %v2228_v19  ;;  %v995_v57 = vpack.c.b16 %v990_v33, %v989_v22 }
 0x187   : > { %2006 = vmatpush.bf16.msrb.mxu0 %v2227_v11  ;;  %2019 = vmatpush.bf16.msrb.mxu1 %v2231_v21  ;;  %v999_v52 = vrot.slane %v995_v57, 6 }
 0x189   : > { %1007 = vst [vmem:[#allocation2 + $0x30] sm:$0xcc] %v999_v52 }
 0x18b   : > { %v2194_v54 = vld [vmem:[#allocation2 + $0x10] sm:$0xf]  ;;  %v2260_v4 = vld [vmem:[#allocation2 + $0x14] sm:$0xf] }
 0x190   : > { %v2264_v55 = vld [vmem:[#allocation2 + $0x2c] sm:$0xf0]  ;;  %v2196_v51 = vld [vmem:[#allocation2 + $0x30] sm:$0xf0] }
 0x191   : > { %v2195_v43 = vor.u32 %v2264_v55, %v2194_v54  ;;  %v2199_v38 = vor.u32 %v2260_v4, %v2196_v51 }
 0x193   : > { %2007 = vmatpush.bf16.msrb.mxu0 %v2195_v43  ;;  %2020 = vmatpush.bf16.msrb.mxu1 %v2199_v38 }
 0x196   : > { %2244 = vmatmul.msk.bf16.vlgmr.msrb.gmra.mxu0 %vm1919_vm9, %v4468_v45  ;;  %2245 = vmatmul.msk.bf16.vlgmr.msrb.gmra.mxu1 %vm1919_vm9, %v4468_v45 }
 0x1d2   : > { %v1817_v26 = vpop.permute.xlu0 %1816 }
 0x1ea   : > { %v1957_v5 = vpop.f32.mrf.mxu0 }
 0x1eb   : > { %v1970_v59 = vpop.f32.mrf.mxu1  ;;  %v1958_v44 = vadd.f32 %v1957_v5, %v1817_v26 }
 0x1ec   : > { %v1971_v62 = vadd.f32 %v1970_v59, %v1817_v26  ;;  %v1983_v14 = vpop.f32.mrf.mxu2 }
 0x1ed   : > { %v1996_v47 = vpop.f32.mrf.mxu3  ;;  %v1984_v34 = vadd.f32 %v1983_v14, %v1817_v26 }
 0x1ee   : > { %v2052_v0 = vpack.c.bf16 %v1971_v62, %v1958_v44  ;;  %v1997_v48 = vadd.f32 %v1996_v47, %v1817_v26 }
 0x1f0   : > { %2053 = vst [vmem:[%s232_s14] sm:$0xff] %v2052_v0  ;;  %v2054_v58 = vpack.c.bf16 %v1997_v48, %v1984_v34 }
 0x1f2   : > { %v1959_v49 = vpop.f32.mrf.mxu0  ;;  %2248 = vst [vmem:[%s232_s14 + $0x8] sm:$0xff] %v2054_v58 }
 0x1f3   : > { %v1972_v60 = vpop.f32.mrf.mxu1 }
 0x1f4   : > { %v1985_v56 = vpop.f32.mrf.mxu2 }
 0x1f5   : > { %v1998_v45 = vpop.f32.mrf.mxu3 }
 0x201   : > { %v2035_v32 = vpop.f32.mrf.mxu2  ;;  %v2048_v20 = vpop.f32.mrf.mxu3 }
 0x202   : > { %v2036_v53 = vadd.f32 %v2035_v32, %v1817_v26  ;;  %v2049_v8 = vadd.f32 %v2048_v20, %v1817_v26 }
 0x204   : > { %v2060_v17 = vpack.c.bf16 %v2049_v8, %v2036_v53 }
 0x206   : > { %2250 = vst [vmem:[%s232_s14 + $0x18] sm:$0xff] %v2060_v17 }
 0x209   : > { %v2037_v7 = vpop.f32.mrf.mxu2  ;;  %v2050_v13 = vpop.f32.mrf.mxu3 }
 0x213   : > { %v2009_v42 = vpop.f32.mrf.mxu0  ;;  %v2022_v1 = vpop.f32.mrf.mxu1 }
 0x214   : > { %v2010_v18 = vadd.f32 %v2009_v42, %v1817_v26  ;;  %v2023_v23 = vadd.f32 %v2022_v1, %v1817_v26 }
 0x216   : > { %v2057_v3 = vpack.c.bf16 %v2023_v23, %v2010_v18 }
 0x218   : > { %2249 = vst [vmem:[%s232_s14 + $0x10] sm:$0xff] %v2057_v3 }
 0x219   : > { %2434 = shalt.err (!%p2431_p8)
}
 0x21a   : > { %s2491_s9 = smov 128   ;;  %s2492_s12 = smov 8  }
 0x21b   : > { %2282 = dma.vmem_to_hbm [thread:$0]  (%p2577_p12), %s2078_s20, 512, %s2080_s24, %s2064_s25, %s2491_s9, %s2491_s9, %s2492_s12   ;;  %v2011_v35 = vpop.f32.mrf.mxu0  ;;  %v2024_v50 = vpop.f32.mrf.mxu1 }
 0x21c PF: > { %p2299_p9 = scmp.ge.s32.totalorder %s2477_s18, 2  ;;  %s2094_s13 = sand.u32 1, %s2465_s15  }
 0x21d   : > { %s2095_s14 = scalar_lea.sflag [#allocation5], %s2094_s13 }
 0x21e   : > { %p2293_p10 = pnand %p2299_p9, %p2582_p2 }
 0x220   : > { %p2294_p13 = pneg %p2293_p10 }
 0x222   : > { %2460 = dma.done.wait (%p2294_p13), %s2095_s14, 512  }
 0x223   : > { %2462 = vsyncadd (%p2294_p13), %s2095_s14, 4294966784  ;;  %p18_p12 = scmp.ge.s32.totalorder %s2557_s29, 6   ;;  %s4940_s15 = smov %s2469_s16 }
 0x224   : > { %s4941_s16 = smov %s2473_s17  ;;  %s4942_s17 = smov %s2569_s6 }
 0x225   : > { %s4943_s18 = smov %s2557_s29  ;;  %20 = sbr.rel (!%p18_p12) target bundleno = 6 (0x6), region = 105 }
 0x22a   :  { %2101 = vsyncpa [#allocation4], 1 }
 0x22b   :  { %2103 = vsyncpa [#allocation4 + $0x1], 1 }
 0x22c   :  { %2104 = vsyncpa [#allocation7], 1 }
 0x22d   :  { %2106 = vsyncpa [#allocation7 + $0x1], 1 }
 0x22e   :  { %2107 = vsyncpa [#allocation5], 1 }
 0x22f   :  { %2109 = vsyncpa [#allocation5 + $0x1], 1 }

</bundles_post_ra>
